<compile_context>
chip_gen: v5e
topology: v5e:2x2
jax: 0.10.0
libtpu: 0.0.40
codegen_flags: <defaults>
</compile_context>

<pallas_src>
import functools

import jax
import jax.numpy as jnp
from jax import lax
from jax.experimental import pallas as pl
from jax.experimental.pallas import tpu as pltpu


# ---------------------------------------------------------------------------
# Kernel helpers
# ---------------------------------------------------------------------------
def _layer_norm(x, w, b, eps=1e-5):
    mean = jnp.mean(x, axis=-1, keepdims=True)
    var = jnp.mean(jnp.square(x - mean), axis=-1, keepdims=True)
    return (x - mean) * lax.rsqrt(var + eps) * w + b


def _gelu_exact(x):
    # PyTorch nn.GELU default (approximate='none'): 0.5*x*(1+erf(x/sqrt(2)))
    return 0.5 * x * (1.0 + lax.erf(x * jnp.float32(0.7071067811865476)))


# ---------------------------------------------------------------------------
# Kernel
# ---------------------------------------------------------------------------
def block_kernel(x_ref,
                 ln1w_ref, ln1b_ref,
                 wq_ref, wk_ref, wv_ref,          # (H, C, hd) each; wq pre-scaled
                 wproj_ref, bproj_ref,            # (H, hd, C), (1, C)
                 ln2w_ref, ln2b_ref,
                 wfc1_ref, bfc1_ref,              # (C, hidden), (1, hidden)
                 wfc2_ref, bfc2_ref,              # (hidden, C), (1, C)
                 o_ref,
                 *, num_heads):
    Bt, N, C = x_ref.shape
    hd = C // num_heads
    M = Bt * N

    # Load small params once (hoisted; no re-broadcast inside the head loop).
    ln1w = ln1w_ref[...]
    ln1b = ln1b_ref[...]
    ln2w = ln2w_ref[...]
    ln2b = ln2b_ref[...]
    bproj = bproj_ref[...]
    bfc1 = bfc1_ref[...]
    bfc2 = bfc2_ref[...]

    # Flatten (Bt, N) -> M tokens: taller MXU M dim for every weight matmul.
    x = x_ref[...].reshape(M, C)

    # ---------------------------- attention ----------------------------
    xn = _layer_norm(x, ln1w, ln1b)

    attn_proj = jnp.zeros((M, C), jnp.float32)
    for h in range(num_heads):                    # static, unrolled
        # Per-head weights selected on the leading axis (cheap contiguous view,
        # no lane-misaligned activation slicing). wq is pre-scaled by hd**-0.5.
        q = jnp.dot(xn, wq_ref[h], preferred_element_type=jnp.float32).reshape(Bt, N, hd)
        k = jnp.dot(xn, wk_ref[h], preferred_element_type=jnp.float32).reshape(Bt, N, hd)
        v = jnp.dot(xn, wv_ref[h], preferred_element_type=jnp.float32).reshape(Bt, N, hd)
        # Batched over the batch tile; the "k transpose" happens inside the MXU
        # contraction -> no in-kernel XLU transpose.
        s = jnp.einsum("bqd,bkd->bqk", q, k, preferred_element_type=jnp.float32)
        s = s - jnp.max(s, axis=-1, keepdims=True)
        p = jnp.exp(s)
        # Single reciprocal + multiply (pass approx=True to push it to the EUP
        # slot if a coarser softmax tolerance is acceptable).
        p = p * pl.reciprocal(jnp.sum(p, axis=-1, keepdims=True))
        o_h = jnp.einsum("bqk,bkd->bqd", p, v, preferred_element_type=jnp.float32)
        # Accumulate this head directly into the output projection (no concat).
        attn_proj = attn_proj + jnp.dot(o_h.reshape(M, hd), wproj_ref[h],
                                        preferred_element_type=jnp.float32)

    x = x + attn_proj + bproj                      # residual 1 (drop_path = id)

    # ------------------------------- MLP --------------------------------
    xn2 = _layer_norm(x, ln2w, ln2b)
    h1 = jnp.dot(xn2, wfc1_ref[...], preferred_element_type=jnp.float32) + bfc1
    h1 = _gelu_exact(h1)
    h2 = jnp.dot(h1, wfc2_ref[...], preferred_element_type=jnp.float32) + bfc2

    o_ref[...] = (x + h2).reshape(Bt, N, C).astype(o_ref.dtype)   # residual 2


# ---------------------------------------------------------------------------
# Wrapper
# ---------------------------------------------------------------------------
def _choose_block_b(B, max_bt=8):
    """Largest batch tile <= max_bt that keeps >=2 grid steps when possible."""
    candidates = [bt for bt in range(1, min(B, max_bt) + 1) if B % bt == 0]
    two_step = [bt for bt in candidates if B // bt >= 2]
    pool = two_step if two_step else candidates
    return max(pool)


def vit_block(x, params, num_heads, block_b=None):
    B, N, C = x.shape
    H = num_heads
    hd = C // H
    scale = hd ** (-0.5)

    # --- one-time wrapper-side weight layout: pre-transpose / pre-split -----
    w_qkv = params["w_qkv"]                                    # (3C, C) torch layout
    wq = w_qkv[:C].reshape(H, hd, C).transpose(0, 2, 1) * scale   # (H, C, hd), scale folded
    wk = w_qkv[C:2 * C].reshape(H, hd, C).transpose(0, 2, 1)      # (H, C, hd)
    wv = w_qkv[2 * C:].reshape(H, hd, C).transpose(0, 2, 1)       # (H, C, hd)
    wproj = params["w_proj"].T.reshape(H, hd, C)                  # (H, hd, C)
    wfc1 = params["w_fc1"].T                                      # (C, hidden)
    wfc2 = params["w_fc2"].T                                      # (hidden, C)
    # TODO(synk): for weight-DMA-bound real-ViT shapes, also down-cast matmul
    # operands to bfloat16 here (kept f32 to preserve the 1e-4 reference tol).

    if block_b is None:
        block_b = _choose_block_b(B)
    assert B % block_b == 0

    def const_spec(arr):
        n = arr.ndim
        return pl.BlockSpec(arr.shape, lambda b, _n=n: (0,) * _n)

    kernel = functools.partial(block_kernel, num_heads=num_heads)

    operands = (x,
                params["ln1_w"], params["ln1_b"],
                wq, wk, wv,
                wproj, params["b_proj"],
                params["ln2_w"], params["ln2_b"],
                wfc1, params["b_fc1"],
                wfc2, params["b_fc2"])

    return pl.pallas_call(
        kernel,
        out_shape=jax.ShapeDtypeStruct((B, N, C), x.dtype),
        grid=(B // block_b,),
        in_specs=[pl.BlockSpec((block_b, N, C), lambda b: (b, 0, 0))]
                 + [const_spec(a) for a in operands[1:]],
        out_specs=pl.BlockSpec((block_b, N, C), lambda b: (b, 0, 0)),
        compiler_params=pltpu.CompilerParams(
            dimension_semantics=("parallel",),
            vmem_limit_bytes=64 << 20),
    )(*operands)


# ---------------------------------------------------------------------------
# Pure-JAX reference (mirrors the PyTorch module exactly)
# ---------------------------------------------------------------------------
def block_ref(x, params, num_heads):
    def ln(x, w, b, eps=1e-5):
        m = x.mean(-1, keepdims=True)
        v = ((x - m) ** 2).mean(-1, keepdims=True)
        return (x - m) / jnp.sqrt(v + eps) * w + b

    B, N, C = x.shape
    hd = C // num_heads
    scale = hd ** (-0.5)

    xn = ln(x, params["ln1_w"][0], params["ln1_b"][0])
    qkv = xn @ params["w_qkv"].T                                    # (B, N, 3C)
    qkv = qkv.reshape(B, N, 3, num_heads, hd).transpose(2, 0, 3, 1, 4)
    q, k, v = qkv[0], qkv[1], qkv[2]
    attn = jnp.einsum("bhqd,bhkd->bhqk", q, k) * scale
    attn = jax.nn.softmax(attn, axis=-1)
    out = jnp.einsum("bhqk,bhkd->bhqd", attn, v).transpose(0, 2, 1, 3).reshape(B, N, C)
    out = out @ params["w_proj"].T + params["b_proj"][0]
    x = x + out

    xn2 = ln(x, params["ln2_w"][0], params["ln2_b"][0])
    h = xn2 @ params["w_fc1"].T + params["b_fc1"][0]
    h = jax.nn.gelu(h, approximate=False)
    h = h @ params["w_fc2"].T + params["b_fc2"][0]
    return x + h


# ---------------------------------------------------------------------------
# Main
# ---------------------------------------------------------------------------
if __name__ == "__main__":
    B, N, dim = 2, 8, 32
    num_heads = 4
    mlp_ratio = 4.0
    hidden = int(dim * mlp_ratio)

    key = jax.random.PRNGKey(0)
    keys = jax.random.split(key, 12)

    params = {
        # LayerNorm params stored as (1, C) so they live as 2-D VMEM tiles
        "ln1_w": 1.0 + 0.02 * jax.random.normal(keys[0], (1, dim), jnp.float32),
        "ln1_b": 0.02 * jax.random.normal(keys[1], (1, dim), jnp.float32),
        "ln2_w": 1.0 + 0.02 * jax.random.normal(keys[2], (1, dim), jnp.float32),
        "ln2_b": 0.02 * jax.random.normal(keys[3], (1, dim), jnp.float32),
        # Attention: qkv (no bias, qkv_bias=False default), proj (with bias)
        "w_qkv": 0.05 * jax.random.normal(keys[4], (3 * dim, dim), jnp.float32),
        "w_proj": 0.05 * jax.random.normal(keys[5], (dim, dim), jnp.float32),
        "b_proj": 0.02 * jax.random.normal(keys[6], (1, dim), jnp.float32),
        # MLP
        "w_fc1": 0.05 * jax.random.normal(keys[7], (hidden, dim), jnp.float32),
        "b_fc1": 0.02 * jax.random.normal(keys[8], (1, hidden), jnp.float32),
        "w_fc2": 0.05 * jax.random.normal(keys[9], (dim, hidden), jnp.float32),
        "b_fc2": 0.02 * jax.random.normal(keys[10], (1, dim), jnp.float32),
    }

    x = jax.random.normal(keys[11], (B, N, dim), jnp.float32)

    out = vit_block(x, params, num_heads)
    out = jax.block_until_ready(out)

    ref = jax.block_until_ready(block_ref(x, params, num_heads))
    assert out.shape == (B, N, dim)
    assert jnp.allclose(out, ref, atol=1e-4, rtol=1e-4), (
        f"max abs err = {jnp.max(jnp.abs(out - ref))}")

    print("KERNEL_OK")
</pallas_src>

<mosaic_0001>
module attributes {stable_mosaic.version = 11 : i64} {
  func.func @block_kernel(%arg0: i32, %arg1: memref<1x8x32xf32, #tpu.memory_space<vmem>>, %arg2: memref<1x32xf32, #tpu.memory_space<vmem>>, %arg3: memref<1x32xf32, #tpu.memory_space<vmem>>, %arg4: memref<4x32x8xf32, #tpu.memory_space<vmem>>, %arg5: memref<4x32x8xf32, #tpu.memory_space<vmem>>, %arg6: memref<4x32x8xf32, #tpu.memory_space<vmem>>, %arg7: memref<4x8x32xf32, #tpu.memory_space<vmem>>, %arg8: memref<1x32xf32, #tpu.memory_space<vmem>>, %arg9: memref<1x32xf32, #tpu.memory_space<vmem>>, %arg10: memref<1x32xf32, #tpu.memory_space<vmem>>, %arg11: memref<32x128xf32, #tpu.memory_space<vmem>>, %arg12: memref<1x128xf32, #tpu.memory_space<vmem>>, %arg13: memref<128x32xf32, #tpu.memory_space<vmem>>, %arg14: memref<1x32xf32, #tpu.memory_space<vmem>>, %arg15: memref<1x8x32xf32, #tpu.memory_space<vmem>>) attributes {dimension_semantics = [#tpu.dimension_semantics<parallel>], iteration_bounds = array<i64: 2>, scalar_prefetch = 0 : i64, scratch_operands = 0 : i64, tpu.core_type = #tpu.core_type<tc>, window_params = [{transform_indices = @transform_0, window_bounds = array<i64: 1, 8, 32>}, {pipeline_mode = #tpu.pipeline_mode<synchronous>, transform_indices = @transform_1, window_bounds = array<i64: 1, 32>}, {pipeline_mode = #tpu.pipeline_mode<synchronous>, transform_indices = @transform_2, window_bounds = array<i64: 1, 32>}, {pipeline_mode = #tpu.pipeline_mode<synchronous>, transform_indices = @transform_3, window_bounds = array<i64: 4, 32, 8>}, {pipeline_mode = #tpu.pipeline_mode<synchronous>, transform_indices = @transform_4, window_bounds = array<i64: 4, 32, 8>}, {pipeline_mode = #tpu.pipeline_mode<synchronous>, transform_indices = @transform_5, window_bounds = array<i64: 4, 32, 8>}, {pipeline_mode = #tpu.pipeline_mode<synchronous>, transform_indices = @transform_6, window_bounds = array<i64: 4, 8, 32>}, {pipeline_mode = #tpu.pipeline_mode<synchronous>, transform_indices = @transform_7, window_bounds = array<i64: 1, 32>}, {pipeline_mode = #tpu.pipeline_mode<synchronous>, transform_indices = @transform_8, window_bounds = array<i64: 1, 32>}, {pipeline_mode = #tpu.pipeline_mode<synchronous>, transform_indices = @transform_9, window_bounds = array<i64: 1, 32>}, {pipeline_mode = #tpu.pipeline_mode<synchronous>, transform_indices = @transform_10, window_bounds = array<i64: 32, 128>}, {pipeline_mode = #tpu.pipeline_mode<synchronous>, transform_indices = @transform_11, window_bounds = array<i64: 1, 128>}, {pipeline_mode = #tpu.pipeline_mode<synchronous>, transform_indices = @transform_12, window_bounds = array<i64: 128, 32>}, {pipeline_mode = #tpu.pipeline_mode<synchronous>, transform_indices = @transform_13, window_bounds = array<i64: 1, 32>}, {transform_indices = @transform_14, window_bounds = array<i64: 1, 8, 32>}]} {
    %c0 = arith.constant 0 : index
    %c0_0 = arith.constant 0 : index
    %0 = vector.load %arg2[%c0, %c0_0] : memref<1x32xf32, #tpu.memory_space<vmem>>, vector<1x32xf32>
    %c0_1 = arith.constant 0 : index
    %c0_2 = arith.constant 0 : index
    %1 = vector.load %arg3[%c0_1, %c0_2] : memref<1x32xf32, #tpu.memory_space<vmem>>, vector<1x32xf32>
    %c0_3 = arith.constant 0 : index
    %c0_4 = arith.constant 0 : index
    %2 = vector.load %arg9[%c0_3, %c0_4] : memref<1x32xf32, #tpu.memory_space<vmem>>, vector<1x32xf32>
    %c0_5 = arith.constant 0 : index
    %c0_6 = arith.constant 0 : index
    %3 = vector.load %arg10[%c0_5, %c0_6] : memref<1x32xf32, #tpu.memory_space<vmem>>, vector<1x32xf32>
    %c0_7 = arith.constant 0 : index
    %c0_8 = arith.constant 0 : index
    %4 = vector.load %arg8[%c0_7, %c0_8] : memref<1x32xf32, #tpu.memory_space<vmem>>, vector<1x32xf32>
    %c0_9 = arith.constant 0 : index
    %c0_10 = arith.constant 0 : index
    %5 = vector.load %arg12[%c0_9, %c0_10] : memref<1x128xf32, #tpu.memory_space<vmem>>, vector<1x128xf32>
    %c0_11 = arith.constant 0 : index
    %c0_12 = arith.constant 0 : index
    %6 = vector.load %arg14[%c0_11, %c0_12] : memref<1x32xf32, #tpu.memory_space<vmem>>, vector<1x32xf32>
    %c0_13 = arith.constant 0 : index
    %c0_14 = arith.constant 0 : index
    %c0_15 = arith.constant 0 : index
    %7 = vector.load %arg1[%c0_13, %c0_14, %c0_15] : memref<1x8x32xf32, #tpu.memory_space<vmem>>, vector<1x8x32xf32>
    %8 = vector.shape_cast %7 : vector<1x8x32xf32> to vector<8x32xf32>
    %cst = arith.constant dense<0.000000e+00> : vector<8xf32>
    %9 = vector.multi_reduction <add>, %8, %cst [1] : vector<8x32xf32> to vector<8xf32>
    %10 = vector.shape_cast %9 : vector<8xf32> to vector<8x1xf32>
    %cst_16 = arith.constant 3.200000e+01 : f32
    %11 = vector.broadcast %cst_16 : f32 to vector<8x1xf32>
    %12 = arith.divf %10, %11 : vector<8x1xf32>
    %13 = vector.broadcast %12 : vector<8x1xf32> to vector<8x32xf32>
    %14 = arith.subf %8, %13 : vector<8x32xf32>
    %15 = arith.mulf %14, %14 : vector<8x32xf32>
    %cst_17 = arith.constant dense<0.000000e+00> : vector<8xf32>
    %16 = vector.multi_reduction <add>, %15, %cst_17 [1] : vector<8x32xf32> to vector<8xf32>
    %17 = vector.shape_cast %16 : vector<8xf32> to vector<8x1xf32>
    %cst_18 = arith.constant 3.200000e+01 : f32
    %18 = vector.broadcast %cst_18 : f32 to vector<8x1xf32>
    %19 = arith.divf %17, %18 : vector<8x1xf32>
    %20 = vector.broadcast %12 : vector<8x1xf32> to vector<8x32xf32>
    %21 = arith.subf %8, %20 : vector<8x32xf32>
    %cst_19 = arith.constant 9.99999974E-6 : f32
    %22 = vector.broadcast %cst_19 : f32 to vector<8x1xf32>
    %23 = arith.addf %19, %22 : vector<8x1xf32>
    %24 = math.rsqrt %23 : vector<8x1xf32>
    %25 = vector.broadcast %24 : vector<8x1xf32> to vector<8x32xf32>
    %26 = arith.mulf %21, %25 : vector<8x32xf32>
    %27 = vector.broadcast %0 : vector<1x32xf32> to vector<8x32xf32>
    %28 = arith.mulf %26, %27 : vector<8x32xf32>
    %29 = vector.broadcast %1 : vector<1x32xf32> to vector<8x32xf32>
    %30 = arith.addf %28, %29 : vector<8x32xf32>
    %cst_20 = arith.constant 0.000000e+00 : f32
    %31 = vector.broadcast %cst_20 : f32 to vector<8x32xf32>
    %c0_21 = arith.constant 0 : index
    %c0_22 = arith.constant 0 : index
    %c0_23 = arith.constant 0 : index
    %32 = vector.load %arg4[%c0_21, %c0_22, %c0_23] : memref<4x32x8xf32, #tpu.memory_space<vmem>>, vector<1x32x8xf32>
    %33 = vector.shape_cast %32 : vector<1x32x8xf32> to vector<32x8xf32>
    %cst_24 = arith.constant dense<0.000000e+00> : vector<8x8xf32>
    %34 = tpu.matmul %30, %33, %cst_24 {dimension_numbers = #tpu.dot_dimension_numbers<[1], [0], [0], [1], [0, 0, 1, 1], [], []>} : vector<8x32xf32>, vector<32x8xf32>, vector<8x8xf32> -> vector<8x8xf32>
    %35 = vector.shape_cast %34 : vector<8x8xf32> to vector<1x8x8xf32>
    %c0_25 = arith.constant 0 : index
    %c0_26 = arith.constant 0 : index
    %c0_27 = arith.constant 0 : index
    %36 = vector.load %arg5[%c0_25, %c0_26, %c0_27] : memref<4x32x8xf32, #tpu.memory_space<vmem>>, vector<1x32x8xf32>
    %37 = vector.shape_cast %36 : vector<1x32x8xf32> to vector<32x8xf32>
    %cst_28 = arith.constant dense<0.000000e+00> : vector<8x8xf32>
    %38 = tpu.matmul %30, %37, %cst_28 {dimension_numbers = #tpu.dot_dimension_numbers<[1], [0], [0], [1], [0, 0, 1, 1], [], []>} : vector<8x32xf32>, vector<32x8xf32>, vector<8x8xf32> -> vector<8x8xf32>
    %39 = vector.shape_cast %38 : vector<8x8xf32> to vector<1x8x8xf32>
    %c0_29 = arith.constant 0 : index
    %c0_30 = arith.constant 0 : index
    %c0_31 = arith.constant 0 : index
    %40 = vector.load %arg6[%c0_29, %c0_30, %c0_31] : memref<4x32x8xf32, #tpu.memory_space<vmem>>, vector<1x32x8xf32>
    %41 = vector.shape_cast %40 : vector<1x32x8xf32> to vector<32x8xf32>
    %cst_32 = arith.constant dense<0.000000e+00> : vector<8x8xf32>
    %42 = tpu.matmul %30, %41, %cst_32 {dimension_numbers = #tpu.dot_dimension_numbers<[1], [0], [0], [1], [0, 0, 1, 1], [], []>} : vector<8x32xf32>, vector<32x8xf32>, vector<8x8xf32> -> vector<8x8xf32>
    %43 = vector.shape_cast %42 : vector<8x8xf32> to vector<1x8x8xf32>
    "tpu.trace_start"() <{level = 10 : i32, message = "bqd,bkd->bqk"}> : () -> ()
    %cst_33 = arith.constant dense<0.000000e+00> : vector<1x8x8xf32>
    %44 = tpu.matmul %35, %39, %cst_33 {dimension_numbers = #tpu.dot_dimension_numbers<[2], [2], [1], [1], [0, 0, 0, 1, 1, 1], [0], [0]>} : vector<1x8x8xf32>, vector<1x8x8xf32>, vector<1x8x8xf32> -> vector<1x8x8xf32>
    "tpu.trace_stop"() : () -> ()
    %cst_34 = arith.constant dense<0xFF800000> : vector<1x8xf32>
    %45 = vector.multi_reduction <maximumf>, %44, %cst_34 [2] : vector<1x8x8xf32> to vector<1x8xf32>
    %46 = vector.shape_cast %45 : vector<1x8xf32> to vector<1x8x1xf32>
    %47 = vector.broadcast %46 : vector<1x8x1xf32> to vector<1x8x8xf32>
    %48 = arith.subf %44, %47 : vector<1x8x8xf32>
    %49 = math.exp %48 : vector<1x8x8xf32>
    %cst_35 = arith.constant dense<0.000000e+00> : vector<1x8xf32>
    %50 = vector.multi_reduction <add>, %49, %cst_35 [2] : vector<1x8x8xf32> to vector<1x8xf32>
    %51 = vector.shape_cast %50 : vector<1x8xf32> to vector<1x8x1xf32>
    %52 = tpu.reciprocal %51 : vector<1x8x1xf32> -> vector<1x8x1xf32>
    %53 = vector.broadcast %52 : vector<1x8x1xf32> to vector<1x8x8xf32>
    %54 = arith.mulf %49, %53 : vector<1x8x8xf32>
    "tpu.trace_start"() <{level = 10 : i32, message = "bqk,bkd->bqd"}> : () -> ()
    %cst_36 = arith.constant dense<0.000000e+00> : vector<1x8x8xf32>
    %55 = tpu.matmul %54, %43, %cst_36 {dimension_numbers = #tpu.dot_dimension_numbers<[2], [1], [1], [2], [0, 0, 0, 1, 1, 2], [0], [0]>} : vector<1x8x8xf32>, vector<1x8x8xf32>, vector<1x8x8xf32> -> vector<1x8x8xf32>
    "tpu.trace_stop"() : () -> ()
    %56 = vector.shape_cast %55 : vector<1x8x8xf32> to vector<8x8xf32>
    %c0_37 = arith.constant 0 : index
    %c0_38 = arith.constant 0 : index
    %c0_39 = arith.constant 0 : index
    %57 = vector.load %arg7[%c0_37, %c0_38, %c0_39] : memref<4x8x32xf32, #tpu.memory_space<vmem>>, vector<1x8x32xf32>
    %58 = vector.shape_cast %57 : vector<1x8x32xf32> to vector<8x32xf32>
    %cst_40 = arith.constant dense<0.000000e+00> : vector<8x32xf32>
    %59 = tpu.matmul %56, %58, %cst_40 {dimension_numbers = #tpu.dot_dimension_numbers<[1], [0], [0], [1], [0, 0, 1, 1], [], []>} : vector<8x8xf32>, vector<8x32xf32>, vector<8x32xf32> -> vector<8x32xf32>
    %60 = arith.addf %31, %59 : vector<8x32xf32>
    %c1 = arith.constant 1 : index
    %c0_41 = arith.constant 0 : index
    %c0_42 = arith.constant 0 : index
    %61 = vector.load %arg4[%c1, %c0_41, %c0_42] : memref<4x32x8xf32, #tpu.memory_space<vmem>>, vector<1x32x8xf32>
    %62 = vector.shape_cast %61 : vector<1x32x8xf32> to vector<32x8xf32>
    %cst_43 = arith.constant dense<0.000000e+00> : vector<8x8xf32>
    %63 = tpu.matmul %30, %62, %cst_43 {dimension_numbers = #tpu.dot_dimension_numbers<[1], [0], [0], [1], [0, 0, 1, 1], [], []>} : vector<8x32xf32>, vector<32x8xf32>, vector<8x8xf32> -> vector<8x8xf32>
    %64 = vector.shape_cast %63 : vector<8x8xf32> to vector<1x8x8xf32>
    %c1_44 = arith.constant 1 : index
    %c0_45 = arith.constant 0 : index
    %c0_46 = arith.constant 0 : index
    %65 = vector.load %arg5[%c1_44, %c0_45, %c0_46] : memref<4x32x8xf32, #tpu.memory_space<vmem>>, vector<1x32x8xf32>
    %66 = vector.shape_cast %65 : vector<1x32x8xf32> to vector<32x8xf32>
    %cst_47 = arith.constant dense<0.000000e+00> : vector<8x8xf32>
    %67 = tpu.matmul %30, %66, %cst_47 {dimension_numbers = #tpu.dot_dimension_numbers<[1], [0], [0], [1], [0, 0, 1, 1], [], []>} : vector<8x32xf32>, vector<32x8xf32>, vector<8x8xf32> -> vector<8x8xf32>
    %68 = vector.shape_cast %67 : vector<8x8xf32> to vector<1x8x8xf32>
    %c1_48 = arith.constant 1 : index
    %c0_49 = arith.constant 0 : index
    %c0_50 = arith.constant 0 : index
    %69 = vector.load %arg6[%c1_48, %c0_49, %c0_50] : memref<4x32x8xf32, #tpu.memory_space<vmem>>, vector<1x32x8xf32>
    %70 = vector.shape_cast %69 : vector<1x32x8xf32> to vector<32x8xf32>
    %cst_51 = arith.constant dense<0.000000e+00> : vector<8x8xf32>
    %71 = tpu.matmul %30, %70, %cst_51 {dimension_numbers = #tpu.dot_dimension_numbers<[1], [0], [0], [1], [0, 0, 1, 1], [], []>} : vector<8x32xf32>, vector<32x8xf32>, vector<8x8xf32> -> vector<8x8xf32>
    %72 = vector.shape_cast %71 : vector<8x8xf32> to vector<1x8x8xf32>
    "tpu.trace_start"() <{level = 10 : i32, message = "bqd,bkd->bqk"}> : () -> ()
    %cst_52 = arith.constant dense<0.000000e+00> : vector<1x8x8xf32>
    %73 = tpu.matmul %64, %68, %cst_52 {dimension_numbers = #tpu.dot_dimension_numbers<[2], [2], [1], [1], [0, 0, 0, 1, 1, 1], [0], [0]>} : vector<1x8x8xf32>, vector<1x8x8xf32>, vector<1x8x8xf32> -> vector<1x8x8xf32>
    "tpu.trace_stop"() : () -> ()
    %cst_53 = arith.constant dense<0xFF800000> : vector<1x8xf32>
    %74 = vector.multi_reduction <maximumf>, %73, %cst_53 [2] : vector<1x8x8xf32> to vector<1x8xf32>
    %75 = vector.shape_cast %74 : vector<1x8xf32> to vector<1x8x1xf32>
    %76 = vector.broadcast %75 : vector<1x8x1xf32> to vector<1x8x8xf32>
    %77 = arith.subf %73, %76 : vector<1x8x8xf32>
    %78 = math.exp %77 : vector<1x8x8xf32>
    %cst_54 = arith.constant dense<0.000000e+00> : vector<1x8xf32>
    %79 = vector.multi_reduction <add>, %78, %cst_54 [2] : vector<1x8x8xf32> to vector<1x8xf32>
    %80 = vector.shape_cast %79 : vector<1x8xf32> to vector<1x8x1xf32>
    %81 = tpu.reciprocal %80 : vector<1x8x1xf32> -> vector<1x8x1xf32>
    %82 = vector.broadcast %81 : vector<1x8x1xf32> to vector<1x8x8xf32>
    %83 = arith.mulf %78, %82 : vector<1x8x8xf32>
    "tpu.trace_start"() <{level = 10 : i32, message = "bqk,bkd->bqd"}> : () -> ()
    %cst_55 = arith.constant dense<0.000000e+00> : vector<1x8x8xf32>
    %84 = tpu.matmul %83, %72, %cst_55 {dimension_numbers = #tpu.dot_dimension_numbers<[2], [1], [1], [2], [0, 0, 0, 1, 1, 2], [0], [0]>} : vector<1x8x8xf32>, vector<1x8x8xf32>, vector<1x8x8xf32> -> vector<1x8x8xf32>
    "tpu.trace_stop"() : () -> ()
    %85 = vector.shape_cast %84 : vector<1x8x8xf32> to vector<8x8xf32>
    %c1_56 = arith.constant 1 : index
    %c0_57 = arith.constant 0 : index
    %c0_58 = arith.constant 0 : index
    %86 = vector.load %arg7[%c1_56, %c0_57, %c0_58] : memref<4x8x32xf32, #tpu.memory_space<vmem>>, vector<1x8x32xf32>
    %87 = vector.shape_cast %86 : vector<1x8x32xf32> to vector<8x32xf32>
    %cst_59 = arith.constant dense<0.000000e+00> : vector<8x32xf32>
    %88 = tpu.matmul %85, %87, %cst_59 {dimension_numbers = #tpu.dot_dimension_numbers<[1], [0], [0], [1], [0, 0, 1, 1], [], []>} : vector<8x8xf32>, vector<8x32xf32>, vector<8x32xf32> -> vector<8x32xf32>
    %89 = arith.addf %60, %88 : vector<8x32xf32>
    %c2 = arith.constant 2 : index
    %c0_60 = arith.constant 0 : index
    %c0_61 = arith.constant 0 : index
    %90 = vector.load %arg4[%c2, %c0_60, %c0_61] : memref<4x32x8xf32, #tpu.memory_space<vmem>>, vector<1x32x8xf32>
    %91 = vector.shape_cast %90 : vector<1x32x8xf32> to vector<32x8xf32>
    %cst_62 = arith.constant dense<0.000000e+00> : vector<8x8xf32>
    %92 = tpu.matmul %30, %91, %cst_62 {dimension_numbers = #tpu.dot_dimension_numbers<[1], [0], [0], [1], [0, 0, 1, 1], [], []>} : vector<8x32xf32>, vector<32x8xf32>, vector<8x8xf32> -> vector<8x8xf32>
    %93 = vector.shape_cast %92 : vector<8x8xf32> to vector<1x8x8xf32>
    %c2_63 = arith.constant 2 : index
    %c0_64 = arith.constant 0 : index
    %c0_65 = arith.constant 0 : index
    %94 = vector.load %arg5[%c2_63, %c0_64, %c0_65] : memref<4x32x8xf32, #tpu.memory_space<vmem>>, vector<1x32x8xf32>
    %95 = vector.shape_cast %94 : vector<1x32x8xf32> to vector<32x8xf32>
    %cst_66 = arith.constant dense<0.000000e+00> : vector<8x8xf32>
    %96 = tpu.matmul %30, %95, %cst_66 {dimension_numbers = #tpu.dot_dimension_numbers<[1], [0], [0], [1], [0, 0, 1, 1], [], []>} : vector<8x32xf32>, vector<32x8xf32>, vector<8x8xf32> -> vector<8x8xf32>
    %97 = vector.shape_cast %96 : vector<8x8xf32> to vector<1x8x8xf32>
    %c2_67 = arith.constant 2 : index
    %c0_68 = arith.constant 0 : index
    %c0_69 = arith.constant 0 : index
    %98 = vector.load %arg6[%c2_67, %c0_68, %c0_69] : memref<4x32x8xf32, #tpu.memory_space<vmem>>, vector<1x32x8xf32>
    %99 = vector.shape_cast %98 : vector<1x32x8xf32> to vector<32x8xf32>
    %cst_70 = arith.constant dense<0.000000e+00> : vector<8x8xf32>
    %100 = tpu.matmul %30, %99, %cst_70 {dimension_numbers = #tpu.dot_dimension_numbers<[1], [0], [0], [1], [0, 0, 1, 1], [], []>} : vector<8x32xf32>, vector<32x8xf32>, vector<8x8xf32> -> vector<8x8xf32>
    %101 = vector.shape_cast %100 : vector<8x8xf32> to vector<1x8x8xf32>
    "tpu.trace_start"() <{level = 10 : i32, message = "bqd,bkd->bqk"}> : () -> ()
    %cst_71 = arith.constant dense<0.000000e+00> : vector<1x8x8xf32>
    %102 = tpu.matmul %93, %97, %cst_71 {dimension_numbers = #tpu.dot_dimension_numbers<[2], [2], [1], [1], [0, 0, 0, 1, 1, 1], [0], [0]>} : vector<1x8x8xf32>, vector<1x8x8xf32>, vector<1x8x8xf32> -> vector<1x8x8xf32>
    "tpu.trace_stop"() : () -> ()
    %cst_72 = arith.constant dense<0xFF800000> : vector<1x8xf32>
    %103 = vector.multi_reduction <maximumf>, %102, %cst_72 [2] : vector<1x8x8xf32> to vector<1x8xf32>
    %104 = vector.shape_cast %103 : vector<1x8xf32> to vector<1x8x1xf32>
    %105 = vector.broadcast %104 : vector<1x8x1xf32> to vector<1x8x8xf32>
    %106 = arith.subf %102, %105 : vector<1x8x8xf32>
    %107 = math.exp %106 : vector<1x8x8xf32>
    %cst_73 = arith.constant dense<0.000000e+00> : vector<1x8xf32>
    %108 = vector.multi_reduction <add>, %107, %cst_73 [2] : vector<1x8x8xf32> to vector<1x8xf32>
    %109 = vector.shape_cast %108 : vector<1x8xf32> to vector<1x8x1xf32>
    %110 = tpu.reciprocal %109 : vector<1x8x1xf32> -> vector<1x8x1xf32>
    %111 = vector.broadcast %110 : vector<1x8x1xf32> to vector<1x8x8xf32>
    %112 = arith.mulf %107, %111 : vector<1x8x8xf32>
    "tpu.trace_start"() <{level = 10 : i32, message = "bqk,bkd->bqd"}> : () -> ()
    %cst_74 = arith.constant dense<0.000000e+00> : vector<1x8x8xf32>
    %113 = tpu.matmul %112, %101, %cst_74 {dimension_numbers = #tpu.dot_dimension_numbers<[2], [1], [1], [2], [0, 0, 0, 1, 1, 2], [0], [0]>} : vector<1x8x8xf32>, vector<1x8x8xf32>, vector<1x8x8xf32> -> vector<1x8x8xf32>
    "tpu.trace_stop"() : () -> ()
    %114 = vector.shape_cast %113 : vector<1x8x8xf32> to vector<8x8xf32>
    %c2_75 = arith.constant 2 : index
    %c0_76 = arith.constant 0 : index
    %c0_77 = arith.constant 0 : index
    %115 = vector.load %arg7[%c2_75, %c0_76, %c0_77] : memref<4x8x32xf32, #tpu.memory_space<vmem>>, vector<1x8x32xf32>
    %116 = vector.shape_cast %115 : vector<1x8x32xf32> to vector<8x32xf32>
    %cst_78 = arith.constant dense<0.000000e+00> : vector<8x32xf32>
    %117 = tpu.matmul %114, %116, %cst_78 {dimension_numbers = #tpu.dot_dimension_numbers<[1], [0], [0], [1], [0, 0, 1, 1], [], []>} : vector<8x8xf32>, vector<8x32xf32>, vector<8x32xf32> -> vector<8x32xf32>
    %118 = arith.addf %89, %117 : vector<8x32xf32>
    %c3 = arith.constant 3 : index
    %c0_79 = arith.constant 0 : index
    %c0_80 = arith.constant 0 : index
    %119 = vector.load %arg4[%c3, %c0_79, %c0_80] : memref<4x32x8xf32, #tpu.memory_space<vmem>>, vector<1x32x8xf32>
    %120 = vector.shape_cast %119 : vector<1x32x8xf32> to vector<32x8xf32>
    %cst_81 = arith.constant dense<0.000000e+00> : vector<8x8xf32>
    %121 = tpu.matmul %30, %120, %cst_81 {dimension_numbers = #tpu.dot_dimension_numbers<[1], [0], [0], [1], [0, 0, 1, 1], [], []>} : vector<8x32xf32>, vector<32x8xf32>, vector<8x8xf32> -> vector<8x8xf32>
    %122 = vector.shape_cast %121 : vector<8x8xf32> to vector<1x8x8xf32>
    %c3_82 = arith.constant 3 : index
    %c0_83 = arith.constant 0 : index
    %c0_84 = arith.constant 0 : index
    %123 = vector.load %arg5[%c3_82, %c0_83, %c0_84] : memref<4x32x8xf32, #tpu.memory_space<vmem>>, vector<1x32x8xf32>
    %124 = vector.shape_cast %123 : vector<1x32x8xf32> to vector<32x8xf32>
    %cst_85 = arith.constant dense<0.000000e+00> : vector<8x8xf32>
    %125 = tpu.matmul %30, %124, %cst_85 {dimension_numbers = #tpu.dot_dimension_numbers<[1], [0], [0], [1], [0, 0, 1, 1], [], []>} : vector<8x32xf32>, vector<32x8xf32>, vector<8x8xf32> -> vector<8x8xf32>
    %126 = vector.shape_cast %125 : vector<8x8xf32> to vector<1x8x8xf32>
    %c3_86 = arith.constant 3 : index
    %c0_87 = arith.constant 0 : index
    %c0_88 = arith.constant 0 : index
    %127 = vector.load %arg6[%c3_86, %c0_87, %c0_88] : memref<4x32x8xf32, #tpu.memory_space<vmem>>, vector<1x32x8xf32>
    %128 = vector.shape_cast %127 : vector<1x32x8xf32> to vector<32x8xf32>
    %cst_89 = arith.constant dense<0.000000e+00> : vector<8x8xf32>
    %129 = tpu.matmul %30, %128, %cst_89 {dimension_numbers = #tpu.dot_dimension_numbers<[1], [0], [0], [1], [0, 0, 1, 1], [], []>} : vector<8x32xf32>, vector<32x8xf32>, vector<8x8xf32> -> vector<8x8xf32>
    %130 = vector.shape_cast %129 : vector<8x8xf32> to vector<1x8x8xf32>
    "tpu.trace_start"() <{level = 10 : i32, message = "bqd,bkd->bqk"}> : () -> ()
    %cst_90 = arith.constant dense<0.000000e+00> : vector<1x8x8xf32>
    %131 = tpu.matmul %122, %126, %cst_90 {dimension_numbers = #tpu.dot_dimension_numbers<[2], [2], [1], [1], [0, 0, 0, 1, 1, 1], [0], [0]>} : vector<1x8x8xf32>, vector<1x8x8xf32>, vector<1x8x8xf32> -> vector<1x8x8xf32>
    "tpu.trace_stop"() : () -> ()
    %cst_91 = arith.constant dense<0xFF800000> : vector<1x8xf32>
    %132 = vector.multi_reduction <maximumf>, %131, %cst_91 [2] : vector<1x8x8xf32> to vector<1x8xf32>
    %133 = vector.shape_cast %132 : vector<1x8xf32> to vector<1x8x1xf32>
    %134 = vector.broadcast %133 : vector<1x8x1xf32> to vector<1x8x8xf32>
    %135 = arith.subf %131, %134 : vector<1x8x8xf32>
    %136 = math.exp %135 : vector<1x8x8xf32>
    %cst_92 = arith.constant dense<0.000000e+00> : vector<1x8xf32>
    %137 = vector.multi_reduction <add>, %136, %cst_92 [2] : vector<1x8x8xf32> to vector<1x8xf32>
    %138 = vector.shape_cast %137 : vector<1x8xf32> to vector<1x8x1xf32>
    %139 = tpu.reciprocal %138 : vector<1x8x1xf32> -> vector<1x8x1xf32>
    %140 = vector.broadcast %139 : vector<1x8x1xf32> to vector<1x8x8xf32>
    %141 = arith.mulf %136, %140 : vector<1x8x8xf32>
    "tpu.trace_start"() <{level = 10 : i32, message = "bqk,bkd->bqd"}> : () -> ()
    %cst_93 = arith.constant dense<0.000000e+00> : vector<1x8x8xf32>
    %142 = tpu.matmul %141, %130, %cst_93 {dimension_numbers = #tpu.dot_dimension_numbers<[2], [1], [1], [2], [0, 0, 0, 1, 1, 2], [0], [0]>} : vector<1x8x8xf32>, vector<1x8x8xf32>, vector<1x8x8xf32> -> vector<1x8x8xf32>
    "tpu.trace_stop"() : () -> ()
    %143 = vector.shape_cast %142 : vector<1x8x8xf32> to vector<8x8xf32>
    %c3_94 = arith.constant 3 : index
    %c0_95 = arith.constant 0 : index
    %c0_96 = arith.constant 0 : index
    %144 = vector.load %arg7[%c3_94, %c0_95, %c0_96] : memref<4x8x32xf32, #tpu.memory_space<vmem>>, vector<1x8x32xf32>
    %145 = vector.shape_cast %144 : vector<1x8x32xf32> to vector<8x32xf32>
    %cst_97 = arith.constant dense<0.000000e+00> : vector<8x32xf32>
    %146 = tpu.matmul %143, %145, %cst_97 {dimension_numbers = #tpu.dot_dimension_numbers<[1], [0], [0], [1], [0, 0, 1, 1], [], []>} : vector<8x8xf32>, vector<8x32xf32>, vector<8x32xf32> -> vector<8x32xf32>
    %147 = arith.addf %118, %146 : vector<8x32xf32>
    %148 = arith.addf %8, %147 : vector<8x32xf32>
    %149 = vector.broadcast %4 : vector<1x32xf32> to vector<8x32xf32>
    %150 = arith.addf %148, %149 : vector<8x32xf32>
    %cst_98 = arith.constant dense<0.000000e+00> : vector<8xf32>
    %151 = vector.multi_reduction <add>, %150, %cst_98 [1] : vector<8x32xf32> to vector<8xf32>
    %152 = vector.shape_cast %151 : vector<8xf32> to vector<8x1xf32>
    %cst_99 = arith.constant 3.200000e+01 : f32
    %153 = vector.broadcast %cst_99 : f32 to vector<8x1xf32>
    %154 = arith.divf %152, %153 : vector<8x1xf32>
    %155 = vector.broadcast %154 : vector<8x1xf32> to vector<8x32xf32>
    %156 = arith.subf %150, %155 : vector<8x32xf32>
    %157 = arith.mulf %156, %156 : vector<8x32xf32>
    %cst_100 = arith.constant dense<0.000000e+00> : vector<8xf32>
    %158 = vector.multi_reduction <add>, %157, %cst_100 [1] : vector<8x32xf32> to vector<8xf32>
    %159 = vector.shape_cast %158 : vector<8xf32> to vector<8x1xf32>
    %cst_101 = arith.constant 3.200000e+01 : f32
    %160 = vector.broadcast %cst_101 : f32 to vector<8x1xf32>
    %161 = arith.divf %159, %160 : vector<8x1xf32>
    %162 = vector.broadcast %154 : vector<8x1xf32> to vector<8x32xf32>
    %163 = arith.subf %150, %162 : vector<8x32xf32>
    %cst_102 = arith.constant 9.99999974E-6 : f32
    %164 = vector.broadcast %cst_102 : f32 to vector<8x1xf32>
    %165 = arith.addf %161, %164 : vector<8x1xf32>
    %166 = math.rsqrt %165 : vector<8x1xf32>
    %167 = vector.broadcast %166 : vector<8x1xf32> to vector<8x32xf32>
    %168 = arith.mulf %163, %167 : vector<8x32xf32>
    %169 = vector.broadcast %2 : vector<1x32xf32> to vector<8x32xf32>
    %170 = arith.mulf %168, %169 : vector<8x32xf32>
    %171 = vector.broadcast %3 : vector<1x32xf32> to vector<8x32xf32>
    %172 = arith.addf %170, %171 : vector<8x32xf32>
    %c0_103 = arith.constant 0 : index
    %c0_104 = arith.constant 0 : index
    %173 = vector.load %arg11[%c0_103, %c0_104] : memref<32x128xf32, #tpu.memory_space<vmem>>, vector<32x128xf32>
    %cst_105 = arith.constant dense<0.000000e+00> : vector<8x128xf32>
    %174 = tpu.matmul %172, %173, %cst_105 {dimension_numbers = #tpu.dot_dimension_numbers<[1], [0], [0], [1], [0, 0, 1, 1], [], []>} : vector<8x32xf32>, vector<32x128xf32>, vector<8x128xf32> -> vector<8x128xf32>
    %175 = vector.broadcast %5 : vector<1x128xf32> to vector<8x128xf32>
    %176 = arith.addf %174, %175 : vector<8x128xf32>
    %cst_106 = arith.constant 5.000000e-01 : f32
    %177 = vector.broadcast %cst_106 : f32 to vector<8x128xf32>
    %178 = arith.mulf %177, %176 : vector<8x128xf32>
    %cst_107 = arith.constant 0.707106769 : f32
    %179 = vector.broadcast %cst_107 : f32 to vector<8x128xf32>
    %180 = arith.mulf %176, %179 : vector<8x128xf32>
    %181 = math.erf %180 : vector<8x128xf32>
    %cst_108 = arith.constant 1.000000e+00 : f32
    %182 = vector.broadcast %cst_108 : f32 to vector<8x128xf32>
    %183 = arith.addf %182, %181 : vector<8x128xf32>
    %184 = arith.mulf %178, %183 : vector<8x128xf32>
    %c0_109 = arith.constant 0 : index
    %c0_110 = arith.constant 0 : index
    %185 = vector.load %arg13[%c0_109, %c0_110] : memref<128x32xf32, #tpu.memory_space<vmem>>, vector<128x32xf32>
    %cst_111 = arith.constant dense<0.000000e+00> : vector<8x32xf32>
    %186 = tpu.matmul %184, %185, %cst_111 {dimension_numbers = #tpu.dot_dimension_numbers<[1], [0], [0], [1], [0, 0, 1, 1], [], []>} : vector<8x128xf32>, vector<128x32xf32>, vector<8x32xf32> -> vector<8x32xf32>
    %187 = vector.broadcast %6 : vector<1x32xf32> to vector<8x32xf32>
    %188 = arith.addf %186, %187 : vector<8x32xf32>
    %189 = arith.addf %150, %188 : vector<8x32xf32>
    %190 = vector.shape_cast %189 : vector<8x32xf32> to vector<1x8x32xf32>
    %c0_112 = arith.constant 0 : index
    %c0_113 = arith.constant 0 : index
    %c0_114 = arith.constant 0 : index
    %191 = vector.load %arg15[%c0_112, %c0_113, %c0_114] : memref<1x8x32xf32, #tpu.memory_space<vmem>>, vector<1x8x32xf32>
    tpu.vector_store %arg15[%c0_112, %c0_113, %c0_114], %190 {strides = array<i32>} : memref<1x8x32xf32, #tpu.memory_space<vmem>>, vector<1x8x32xf32>,
    return
  }
  func.func @transform_0(%arg0: i32) -> (i32, i32, i32) {
    %c0_i32 = arith.constant 0 : i32
    %c0_i32_0 = arith.constant 0 : i32
    %c0_i32_1 = arith.constant 0 : i32
    return %arg0, %c0_i32, %c0_i32_0 : i32, i32, i32
  }
  func.func @transform_1(%arg0: i32) -> (i32, i32) {
    %c0_i32 = arith.constant 0 : i32
    %c0_i32_0 = arith.constant 0 : i32
    %c0_i32_1 = arith.constant 0 : i32
    return %c0_i32, %c0_i32_0 : i32, i32
  }
  func.func @transform_2(%arg0: i32) -> (i32, i32) {
    %c0_i32 = arith.constant 0 : i32
    %c0_i32_0 = arith.constant 0 : i32
    %c0_i32_1 = arith.constant 0 : i32
    return %c0_i32, %c0_i32_0 : i32, i32
  }
  func.func @transform_3(%arg0: i32) -> (i32, i32, i32) {
    %c0_i32 = arith.constant 0 : i32
    %c0_i32_0 = arith.constant 0 : i32
    %c0_i32_1 = arith.constant 0 : i32
    %c0_i32_2 = arith.constant 0 : i32
    return %c0_i32, %c0_i32_0, %c0_i32_1 : i32, i32, i32
  }
  func.func @transform_4(%arg0: i32) -> (i32, i32, i32) {
    %c0_i32 = arith.constant 0 : i32
    %c0_i32_0 = arith.constant 0 : i32
    %c0_i32_1 = arith.constant 0 : i32
    %c0_i32_2 = arith.constant 0 : i32
    return %c0_i32, %c0_i32_0, %c0_i32_1 : i32, i32, i32
  }
  func.func @transform_5(%arg0: i32) -> (i32, i32, i32) {
    %c0_i32 = arith.constant 0 : i32
    %c0_i32_0 = arith.constant 0 : i32
    %c0_i32_1 = arith.constant 0 : i32
    %c0_i32_2 = arith.constant 0 : i32
    return %c0_i32, %c0_i32_0, %c0_i32_1 : i32, i32, i32
  }
  func.func @transform_6(%arg0: i32) -> (i32, i32, i32) {
    %c0_i32 = arith.constant 0 : i32
    %c0_i32_0 = arith.constant 0 : i32
    %c0_i32_1 = arith.constant 0 : i32
    %c0_i32_2 = arith.constant 0 : i32
    return %c0_i32, %c0_i32_0, %c0_i32_1 : i32, i32, i32
  }
  func.func @transform_7(%arg0: i32) -> (i32, i32) {
    %c0_i32 = arith.constant 0 : i32
    %c0_i32_0 = arith.constant 0 : i32
    %c0_i32_1 = arith.constant 0 : i32
    return %c0_i32, %c0_i32_0 : i32, i32
  }
  func.func @transform_8(%arg0: i32) -> (i32, i32) {
    %c0_i32 = arith.constant 0 : i32
    %c0_i32_0 = arith.constant 0 : i32
    %c0_i32_1 = arith.constant 0 : i32
    return %c0_i32, %c0_i32_0 : i32, i32
  }
  func.func @transform_9(%arg0: i32) -> (i32, i32) {
    %c0_i32 = arith.constant 0 : i32
    %c0_i32_0 = arith.constant 0 : i32
    %c0_i32_1 = arith.constant 0 : i32
    return %c0_i32, %c0_i32_0 : i32, i32
  }
  func.func @transform_10(%arg0: i32) -> (i32, i32) {
    %c0_i32 = arith.constant 0 : i32
    %c0_i32_0 = arith.constant 0 : i32
    %c0_i32_1 = arith.constant 0 : i32
    return %c0_i32, %c0_i32_0 : i32, i32
  }
  func.func @transform_11(%arg0: i32) -> (i32, i32) {
    %c0_i32 = arith.constant 0 : i32
    %c0_i32_0 = arith.constant 0 : i32
    %c0_i32_1 = arith.constant 0 : i32
    return %c0_i32, %c0_i32_0 : i32, i32
  }
  func.func @transform_12(%arg0: i32) -> (i32, i32) {
    %c0_i32 = arith.constant 0 : i32
    %c0_i32_0 = arith.constant 0 : i32
    %c0_i32_1 = arith.constant 0 : i32
    return %c0_i32, %c0_i32_0 : i32, i32
  }
  func.func @transform_13(%arg0: i32) -> (i32, i32) {
    %c0_i32 = arith.constant 0 : i32
    %c0_i32_0 = arith.constant 0 : i32
    %c0_i32_1 = arith.constant 0 : i32
    return %c0_i32, %c0_i32_0 : i32, i32
  }
  func.func @transform_14(%arg0: i32) -> (i32, i32, i32) {
    %c0_i32 = arith.constant 0 : i32
    %c0_i32_0 = arith.constant 0 : i32
    %c0_i32_1 = arith.constant 0 : i32
    return %arg0, %c0_i32, %c0_i32_0 : i32, i32, i32
  }
}

</mosaic_0001>

<bundles_post_ra>
// kernel: tpu_custom_call.1
= control target key start
LH: loop header
LB: loop body
LE: loop exit
PB: predicated region body
PF: predicated region fallthrough
CT: control target
= control target key end

     0   :  { %s2116_s0 = inlined_call_operand.vmem [shape: f32[2,8,32], index: 0, kind: input, shape index: {}]   ;;  %s2117_s1 = inlined_call_operand.vmem [shape: f32[1,32], index: 1, kind: input, shape index: {}]   ;;  %s2118_s2 = inlined_call_operand.vmem [shape: f32[1,32], index: 2, kind: input, shape index: {}]   ;;  %s2119_s3 = inlined_call_operand.vmem [shape: f32[4,32,8], index: 3, kind: input, shape index: {}]   ;;  %s2120_s4 = inlined_call_operand.vmem [shape: f32[4,32,8], index: 4, kind: input, shape index: {}]   ;;  %s2121_s5 = inlined_call_operand.vmem [shape: f32[4,32,8], index: 5, kind: input, shape index: {}]   ;;  %s2122_s6 = inlined_call_operand.vmem [shape: f32[4,8,32], index: 6, kind: input, shape index: {}]   ;;  %s2123_s7 = inlined_call_operand.vmem [shape: f32[1,32], index: 7, kind: input, shape index: {}]   ;;  %s2124_s8 = inlined_call_operand.vmem [shape: f32[1,32], index: 8, kind: input, shape index: {}]   ;;  %s2125_s9 = inlined_call_operand.vmem [shape: f32[1,32], index: 9, kind: input, shape index: {}]   ;;  %s2126_s10 = inlined_call_operand.vmem [shape: f32[32,128], index: 10, kind: input, shape index: {}]   ;;  %s2127_s11 = inlined_call_operand.vmem [shape: f32[1,128], index: 11, kind: input, shape index: {}]   ;;  %s2128_s12 = inlined_call_operand.vmem [shape: f32[128,32], index: 12, kind: input, shape index: {}]   ;;  %s2129_s13 = inlined_call_operand.vmem [shape: f32[1,32], index: 13, kind: input, shape index: {}]   ;;  %s2130_s14 = inlined_call_operand.hbm [shape: f32[2,8,32], index: 14, kind: output, shape index: {}]  }
   0x1   :  { %2132 = sst [smem:[#allocation7_spill]] %s2116_s0 }
   0x2   :  { %2133 = sst [smem:[#allocation8_spill]] %s2117_s1 }
   0x3   :  { %2134 = sst [smem:[#allocation9_spill]] %s2118_s2 }
   0x4   :  { %19 = vsyncpa [#allocation3], 0 }
   0x5   :  { %21 = vsyncpa [#allocation3 + $0x1], 0  ;;  %s1718_s29 = smov 0   ;;  %s1720_s30 = smov 0  }
   0x6   :  { %s1722_s15 = smov 0   ;;  %s1724_s16 = smov 0  }
   0x7 LB: > { %2135 = sst [smem:[#allocation5_spill]] %s1636_s15  ;;  %s1739_s17 = sadd.s32 4294967295, %s1640_s16   ;;  %s1640_s16 = sphi %s1724_s16, %s2146_s16   ;;  %s1636_s15 = sphi %s1722_s15, %s2143_s15   ;;  %s1632_s30 = sphi %s1720_s30, %s2145_s30   ;;  %s1628_s29 = sphi %s1718_s29, %s2144_s29  }
   0x8   : > { %s1428_s18 = sadd.s32 4294967294, %s1640_s16   ;;  %s1743_s19 = sadd.s32 1, %s1640_s16  }
   0x9   : > { %s333_s20 = sadd.s32 1, %s1636_s15  ;;  %s330_s21 = ssub.s32 %s1640_s16, %s1743_s19 }
   0xa   : > { %p343_p0 = scmp.ne.s32.totalorder %s1636_s15, %s1632_s30  ;;  %p331_p1 = scmp.eq.s32.totalorder %s330_s21, 0 }
   0xb   : > { %p344_p2 = scmp.eq.s32.totalorder %s1739_s17, 1  ;;  %p349_p3 = scmp.ne.s32.totalorder %s1632_s30, %s1628_s29 }
   0xc   : > { %p350_p4 = scmp.eq.s32.totalorder %s1428_s18, 1  ;;  %p1431_p7 = scmp.ge.s32.totalorder %s1640_s16, 1 }
   0xd   : > { %s1754_s22 = scalar_select %p331_p1, %s1636_s15, %s333_s20  }
   0xe   : > { %p1756_p5 = por %p344_p2, %p343_p0  ;;  %p1760_p6 = por %p350_p4, %p349_p3 }
   0xf   : > { %2136 = sst [smem:[#allocation6_spill]] %s1754_s22  ;;  %p414_p8 = scmp.lt.s32.totalorder %s1640_s16, 3 }
  0x11   : > { %p415_p9 = pnand %p1431_p7, %p414_p8 }
  0x12   : > { %p459_p10 = scmp.lt.s32.totalorder (!%p415_p9), %s1739_s17, 1  ;;  %s2139_s0 = sld [smem:[#allocation7_spill]] (!%p415_p9) }
  0x13   : > { %418 = sbr.rel (%p415_p9) target bundleno = 3147 (0xc4b), region = 76  ;;  %s2140_s1 = sld [smem:[#allocation8_spill]] (!%p415_p9) }
  0x14   : > { %s2141_s2 = sld [smem:[#allocation9_spill]] (!%p415_p9)  ;;  %s1504_s15 = sshll.u32 (!%p415_p9), %s1739_s17, 3 }
  0x18   : > { %s460_s25 = scalar_select %p459_p10, %s1739_s17, 1  ;;  %vm471_vm0 = vcmask 261120   ;;  %v1642_v2 = vmov 32.0   ;;  %v512_v14 = vld [vmem:[%s2119_s3 + $0x18] sm:$0xff]  ;;  %v511_v16 = vld [vmem:[%s2119_s3 + $0x10] sm:$0xff]  ;;  %v510_v18 = vld [vmem:[%s2119_s3 + $0x8] sm:$0xff] }
  0x19   : > { %1554 = vrcp.f32 %v1642_v2  ;;  %v563_v15 = vld [vmem:[%s2121_s5 + $0x18] sm:$0xff]  ;;  %528 = vmatpush.msra.mxu1 %v512_v14  ;;  %v562_v17 = vld [vmem:[%s2121_s5 + $0x10] sm:$0xff]  ;;  %v561_v19 = vld [vmem:[%s2121_s5 + $0x8] sm:$0xff]  ;;  %vm584_vm5 = vcmask 64512  }
  0x1a   : > { %s1433_s26 = sshll.u32 %s460_s25, 3  ;;  %576 = vmatpush.msra.mxu2 %v563_v15  ;;  %v509_v20 = vld [vmem:[%s2119_s3] sm:$0xff]  ;;  %v539_v22 = vld [vmem:[%s2120_s4 + $0x18] sm:$0xff]  ;;  %v538_v24 = vld [vmem:[%s2120_s4 + $0x10] sm:$0xff] }
  0x1b   : > { %s462_s18 = scalar_lea.vmem %s2139_s0, %s1433_s26  ;;  %529 = vmatpush.msra.mxu1 %v511_v16  ;;  %v560_v21 = vld [vmem:[%s2121_s5] sm:$0xff]  ;;  %v1443_v23 = vld [vmem:[%s2119_s3 + $0x38] sm:$0xff]  ;;  %v1442_v25 = vld [vmem:[%s2119_s3 + $0x30] sm:$0xff]  ;;  %s456_s0 = sand.u32 1, %s1632_s30  }
  0x1c   : > { %v1771_v0 = vld [vmem:[%s462_s18] sm:$0xff]  ;;  %577 = vmatpush.msra.mxu2 %v562_v17  ;;  %v537_v26 = vld [vmem:[%s2120_s4 + $0x8] sm:$0xff]  ;;  %v1448_v45 = vld [vmem:[%s2120_s4 + $0x38] sm:$0xff]  ;;  %s1432_s18 = sshll.u32 %s456_s0, 3  ;;  %s1364_s26 = scalar_lea.hbm %s2130_s14, %s1504_s15 }
  0x1d   : > { %v472_v1 = vsel %vm471_vm0, %v1771_v0, 0.0  ;;  %530 = vmatpush.msra.mxu1 %v510_v18  ;;  %v1441_v27 = vld [vmem:[%s2119_s3 + $0x28] sm:$0xff]  ;;  %v536_v30 = vld [vmem:[%s2120_s4] sm:$0xff]  ;;  %v1453_v46 = vld [vmem:[%s2121_s5 + $0x38] sm:$0xff]  ;;  %s458_s27 = scalar_lea.vmem [#allocation2], %s1432_s18  ;;  %s1354_s17 = scalar_lea.sflag [#allocation3], %s456_s0 }
  0x1e   : > { %473 = vadd.xlane.f32.xlu0 %v472_v1  ;;  %578 = vmatpush.msra.mxu2 %v561_v19  ;;  %v1440_v31 = vld [vmem:[%s2119_s3 + $0x20] sm:$0xff]  ;;  %v1447_v47 = vld [vmem:[%s2120_s4 + $0x30] sm:$0xff]  ;;  %v1446_v49 = vld [vmem:[%s2120_s4 + $0x28] sm:$0xff]  ;;  %s1366_s28 = sshll.u32 %s458_s27, 4  ;;  %s1598_s18 = scalar_lea.hbm %s2130_s14, 16  ;;  %s1367_s28 = int_to_ptr.vmem [resolvable:$true] %s1366_s28 }
  0x1f   : > { %v1555_v3 = vpop.eup %1554  ;;  %531 = vmatpush.msra.mxu1 %v509_v20  ;;  %v1547_v39 = vld [vmem:[%s2140_s1] ss:$0 sm:$0xff]  ;;  %v1452_v48 = vld [vmem:[%s2121_s5 + $0x30] sm:$0xff]  ;;  %v1451_v50 = vld [vmem:[%s2121_s5 + $0x28] sm:$0xff]  ;;  %s1368_s1 = sshll.u32 %s1364_s26, 4  ;;  %s1369_s1 = int_to_ptr.hbm [resolvable:$true] %s1368_s1 }
  0x20   : > { %v476_v4 = vmul.f32 32.0, %v1555_v3  ;;  %vm480_vm1 = vweird.f32 %v1555_v3  ;;  %579 = vmatpush.msra.mxu2 %v560_v21  ;;  %v1548_v41 = vld [vmem:[%s2141_s2] ss:$0 sm:$0xff]  ;;  %v1464_v16 = vld [vmem:[%s2119_s3 + $0x58] sm:$0xff]  ;;  %v1463_v17 = vld [vmem:[%s2119_s3 + $0x50] sm:$0xff]  ;;  %s1592_s2 = sshra.s32 %s1369_s1, 4  ;;  %s1593_s2 = int_to_ptr.hbm [resolvable:$true] %s1592_s2 }
  0x21   : > { %552 = vmatpush.msrb.mxu1 %v539_v22  ;;  %v1445_v51 = vld [vmem:[%s2120_s4 + $0x20] sm:$0xff]  ;;  %v1462_v18 = vld [vmem:[%s2119_s3 + $0x48] sm:$0xff]  ;;  %s1594_s22 = scalar_lea.hbm %s1593_s2, 8  ;;  %p1599_p0 = scmp.lt.s32.totalorder %s1593_s2, %s2130_s14 }
  0x22   : > { %v477_v5 = vsub.f32 1.0, %v476_v4  ;;  %676 = vmatpush.msrb.mxu2 %v1443_v23  ;;  %v1450_v52 = vld [vmem:[%s2121_s5 + $0x20] sm:$0xff]  ;;  %p1595_p11 = scmp.ne.s32.totalorder %s1593_s2, %s1594_s22  ;;  %p1600_p1 = scmp.lt.s32.totalorder %s1598_s18, %s1594_s22 }
  0x23   : > { %553 = vmatpush.msrb.mxu1 %v538_v24  ;;  %v1461_v19 = vld [vmem:[%s2119_s3 + $0x40] sm:$0xff] }
  0x24   : > { %v478_v6 = vmul.f32 %v1555_v3, %v477_v5  ;;  %677 = vmatpush.msrb.mxu2 %v1442_v25  ;;  %v658_v20 = vld [vmem:[%s2122_s6] sm:$0xff]  ;;  %p1596_p12 = pnand %p1595_p11, %p1756_p5  ;;  %p1601_p2 = por %p1600_p1, %p1599_p0 }
  0x25   : > { %554 = vmatpush.msrb.mxu1 %v537_v26 }
  0x26   : > { %v479_v7 = vadd.f32 %v1555_v3, %v478_v6  ;;  %678 = vmatpush.msrb.mxu2 %v1441_v27  ;;  %p1597_p13 = pneg %p1596_p12 }
  0x27   : > { %555 = vmatpush.msrb.mxu1 %v536_v30  ;;  %v1468_v30 = vld [vmem:[%s2120_s4 + $0x50] sm:$0xff] }
  0x28   : > { %v1775_v8 = vsel %vm480_vm1, %v1555_v3, %v479_v7  ;;  %679 = vmatpush.msrb.mxu2 %v1440_v31  ;;  %v1467_v31 = vld [vmem:[%s2120_s4 + $0x48] sm:$0xff]  ;;  %p1602_p3 = pnand %p1601_p2, %p1597_p13 }
  0x91   : > { %v474_v9 = vpop.xlane.xlu0 %473 }
  0x92   : > { %v482_v10 = vmul.f32 %v1775_v8, %v474_v9 }
  0x94   : > { %v483_v11 = vsub.f32 %v1771_v0, %v482_v10 }
  0x96   : > { %v484_v12 = vmul.f32 %v483_v11, %v483_v11 }
  0x98   : > { %v485_v13 = vsel %vm471_vm0, %v484_v12, 0.0 }
  0x99   : > { %486 = vadd.xlane.f32.xlu0 %v485_v13 }
 0x10c   : > { %v487_v28 = vpop.xlane.xlu0 %486 }
 0x10d   : > { %v488_v29 = vmul.f32 %v487_v28, %v1775_v8 }
 0x10f   : > { %v489_v32 = vadd.f32 1e-05, %v488_v29  ;;  %v1469_v29 = vld [vmem:[%s2120_s4 + $0x58] sm:$0xff] }
 0x111   : > { %1556 = vrsqrt.f32 %v489_v32  ;;  %vm496_vm3 = vweird.f32 %v489_v32 }
 0x117   : > { %v1557_v33 = vpop.eup %1556 }
 0x118   : > { %v491_v34 = vmul.f32 %v1557_v33, %v489_v32  ;;  %vm497_vm2 = vweird.f32 %v1557_v33  ;;  %v1466_v32 = vld [vmem:[%s2120_s4 + $0x40] sm:$0xff] }
 0x119   : > { %vm498_vm4 = vmor %vm496_vm3, %vm497_vm2 }
 0x11a   : > { %v492_v35 = vmul.f32 %v1557_v33, %v491_v34 }
 0x11c   : > { %v493_v36 = vmul.f32 0.5, %v492_v35 }
 0x11e   : > { %v494_v37 = vsub.f32 1.5, %v493_v36 }
 0x120   : > { %v495_v38 = vmul.f32 %v1557_v33, %v494_v37 }
 0x122   : > { %v499_v40 = vsel %vm498_vm4, %v1557_v33, %v495_v38 }
 0x123   : > { %v500_v42 = vmul.f32 %v499_v40, %v483_v11 }
 0x125   : > { %v504_v43 = vmul.f32 %v1547_v39, %v500_v42 }
 0x127   : > { %v1835_v44 = vadd.f32 %v1548_v41, %v504_v43 }
 0x129   : > { %1434 = vmatmul.msk.f32.vlgmr.msra.gmra.mxu1 %vm471_vm0, %v1835_v44  ;;  %1436 = vmatmul.msk.f32.vlgmr.msra.gmra.mxu2 %vm471_vm0, %v1835_v44 }
 0x12a   : > { %701 = vmatpush.msra.mxu1 %v1448_v45  ;;  %726 = vmatpush.msra.mxu2 %v1453_v46  ;;  %v1458_v46 = vld [vmem:[%s2122_s6 + $0x8] sm:$0xff] }
 0x12c   : > { %702 = vmatpush.msra.mxu1 %v1447_v47  ;;  %727 = vmatpush.msra.mxu2 %v1452_v48  ;;  %v1474_v47 = vld [vmem:[%s2121_s5 + $0x58] sm:$0xff]  ;;  %v1473_v48 = vld [vmem:[%s2121_s5 + $0x50] sm:$0xff] }
 0x12e   : > { %703 = vmatpush.msra.mxu1 %v1446_v49  ;;  %728 = vmatpush.msra.mxu2 %v1451_v50  ;;  %v1472_v49 = vld [vmem:[%s2121_s5 + $0x48] sm:$0xff]  ;;  %v1471_v50 = vld [vmem:[%s2121_s5 + $0x40] sm:$0xff] }
 0x130   : > { %704 = vmatpush.msra.mxu1 %v1445_v51  ;;  %729 = vmatpush.msra.mxu2 %v1450_v52  ;;  %v1484_v51 = vld [vmem:[%s2119_s3 + $0x78] sm:$0xff] }
 0x131   : > { %1435 = vmatmul.msk.f32.vlgmr.msrb.gmra.mxu1 %vm471_vm0, %v1835_v44  ;;  %1444 = vmatmul.msk.f32.vlgmr.msrb.gmra.mxu2 %vm471_vm0, %v1835_v44 }
 0x132   : > { %850 = vmatpush.msrb.mxu2 %v658_v20  ;;  %827 = vmatpush.msrb.mxu1 %v1458_v46 }
 0x139   : > { %1449 = vmatmul.msk.f32.vlgmr.msra.gmra.mxu1 %vm471_vm0, %v1835_v44  ;;  %1454 = vmatmul.msk.f32.vlgmr.msra.gmra.mxu2 %vm471_vm0, %v1835_v44 }
 0x13a   : > { %922 = vmatpush.msra.mxu1 %v1474_v47 }
 0x13c   : > { %923 = vmatpush.msra.mxu1 %v1473_v48 }
 0x13e   : > { %924 = vmatpush.msra.mxu1 %v1472_v49 }
 0x140   : > { %925 = vmatpush.msra.mxu1 %v1471_v50 }
 0x1a6   : > { %v533_v53 = vpop.f32.mrf.mxu1 }
 0x1ac   : > { %v581_v54 = vpop.f32.mrf.mxu2 }
 0x1ae   : > { %v557_v55 = vpop.f32.mrf.mxu1 }
 0x1af   : > { %1437 = vmatpush.xpose.msk.msra.mxu3 %vm584_vm5, %v557_v55  ;;  %v1481_v55 = vld [vmem:[%s2119_s3 + $0x60] sm:$0xff] }
 0x1b2   : > { %1438 = vmatmul.msk.f32.vlgmr.msra.gmra.mxu3 %vm584_vm5, %v533_v53  ;;  %v1483_v53 = vld [vmem:[%s2119_s3 + $0x70] sm:$0xff] }
 0x1b3   : > { %653 = vmatpush.msrb.mxu3 %v581_v54  ;;  %v1482_v54 = vld [vmem:[%s2119_s3 + $0x68] sm:$0xff] }
 0x1b4   : > { %v681_v56 = vpop.f32.mrf.mxu2 }
 0x1b6   : > { %v706_v57 = vpop.f32.mrf.mxu1 }
 0x1b7   : > { %1455 = vmatpush.xpose.msk.msra.mxu3 %vm584_vm5, %v706_v57 }
 0x1bc   : > { %v731_v58 = vpop.f32.mrf.mxu2 }
 0x1bd   : > { %802 = vmatpush.msra.mxu0 %v731_v58  ;;  %v1488_v58 = vld [vmem:[%s2120_s4 + $0x70] sm:$0xff] }
 0x1bf   : > { %897 = vmatpush.msrb.mxu0 %v1469_v29 }
 0x1c1   : > { %898 = vmatpush.msrb.mxu0 %v1468_v30 }
 0x1c3   : > { %899 = vmatpush.msrb.mxu0 %v1467_v31 }
 0x1c5   : > { %900 = vmatpush.msrb.mxu0 %v1466_v32 }
 0x235   : > { %v608_v59 = vpop.f32.mrf.mxu3 }
 0x236   : > { %v611_v60 = vsel %vm584_vm5, %v608_v59, -inf }
 0x237   : > { %612 = vmax.xlane.f32.xlu1 %v611_v60  ;;  %v1487_v60 = vld [vmem:[%s2120_s4 + $0x68] sm:$0xff] }
 0x2aa   : > { %v613_v61 = vpop.xlane.xlu1 %612 }
 0x2ab   : > { %v614_v62 = vsub.f32 %v608_v59, %v613_v61  ;;  %v1486_v61 = vld [vmem:[%s2120_s4 + $0x60] sm:$0xff] }
 0x2ad   : > { %v615_v63 = vmul.f32 1.442695, %v614_v62  ;;  %v1479_v62 = vld [vmem:[%s2122_s6 + $0x10] sm:$0xff] }
 0x2af   : > { %1558 = vpow2.f32 %v615_v63 }
 0x2b5   : > { %v1559_v1 = vpop.eup %1558 }
 0x2b6   : > { %v617_v2 = vsel %vm584_vm5, %v1559_v1, 0.0 }
 0x2b7   : > { %618 = vadd.xlane.f32.xlu1 %v617_v2 }
 0x32a   : > { %v619_v3 = vpop.xlane.xlu1 %618 }
 0x32b   : > { %1560 = vrcp.f32 %v619_v3  ;;  %v631_v7 = vand.u32 2147483648, %v619_v3  ;;  %v629_v10 = vand.u32 2147483647, %v619_v3  ;;  %vm625_vm7 = vweird.f32 %v619_v3 }
 0x32d   : > { %v632_v12 = vor.u32 1.1754944e-38, %v631_v7  ;;  %vm630_vm9 = vcmp.eq.f32.partialorder %v629_v10, 8.507059e+37 }
 0x331   : > { %v1561_v4 = vpop.eup %1560 }
 0x332   : > { %v621_v5 = vmul.f32 %v1561_v4, %v619_v3  ;;  %vm626_vm6 = vweird.f32 %v1561_v4 }
 0x333   : > { %vm627_vm8 = vmor %vm625_vm7, %vm626_vm6 }
 0x334   : > { %v622_v6 = vsub.f32 1.0, %v621_v5 }
 0x336   : > { %v623_v9 = vmul.f32 %v1561_v4, %v622_v6 }
 0x338   : > { %v624_v11 = vadd.f32 %v1561_v4, %v623_v9 }
 0x33a   : > { %v628_v13 = vsel %vm627_vm8, %v1561_v4, %v624_v11 }
 0x33b   : > { %v633_v14 = vsel %vm630_vm9, %v632_v12, %v628_v13  ;;  %v1494_v13 = vld [vmem:[%s2121_s5 + $0x78] sm:$0xff] }
 0x33c   : > { %v634_v15 = vmul.f32 %v1559_v1, %v633_v14  ;;  %v1493_v14 = vld [vmem:[%s2121_s5 + $0x70] sm:$0xff] }
 0x33e   : > { %1439 = vmatmul.msk.f32.vlgmr.msrb.gmra.mxu3 %vm584_vm5, %v634_v15  ;;  %v1492_v15 = vld [vmem:[%s2121_s5 + $0x68] sm:$0xff] }
 0x33f   : > { %872 = vmatpush.msrb.mxu3 %v1464_v16  ;;  %v1491_v16 = vld [vmem:[%s2121_s5 + $0x60] sm:$0xff] }
 0x341   : > { %873 = vmatpush.msrb.mxu3 %v1463_v17 }
 0x343   : > { %874 = vmatpush.msrb.mxu3 %v1462_v18 }
 0x345   : > { %875 = vmatpush.msrb.mxu3 %v1461_v19 }
 0x346   : > { %1456 = vmatmul.msk.f32.vlgmr.msra.gmra.mxu3 %vm584_vm5, %v681_v56  ;;  %v1489_v56 = vld [vmem:[%s2120_s4 + $0x78] sm:$0xff] }
 0x34e   : > { %1465 = vmatmul.msk.f32.vlgmr.msrb.gmra.mxu3 %vm471_vm0, %v1835_v44 }
 0x3c1   : > { %v655_v21 = vpop.f32.mrf.mxu3 }
 0x3c2   : > { %1460 = vmatmul.msk.f32.vlgmr.msrb.gmra.mxu2 %vm584_vm5, %v655_v21 }
 0x3c9   : > { %v757_v22 = vpop.f32.mrf.mxu3 }
 0x3ca   : > { %v760_v23 = vsel %vm584_vm5, %v757_v22, -inf }
 0x3cb   : > { %761 = vmax.xlane.f32.xlu2 %v760_v23 }
 0x3d1   : > { %v877_v59 = vpop.f32.mrf.mxu3 }
 0x43e   : > { %v762_v24 = vpop.xlane.xlu2 %761 }
 0x43f   : > { %v763_v25 = vsub.f32 %v757_v22, %v762_v24 }
 0x441   : > { %v764_v26 = vmul.f32 1.442695, %v763_v25 }
 0x443   : > { %1562 = vpow2.f32 %v764_v26 }
 0x445   : > { %v852_v63 = vpop.f32.mrf.mxu2 }
 0x449   : > { %v1563_v27 = vpop.eup %1562 }
 0x44a   : > { %v766_v28 = vsel %vm584_vm5, %v1563_v27, 0.0 }
 0x44b   : > { %767 = vadd.xlane.f32.xlu2 %v766_v28 }
 0x4be   : > { %v768_v33 = vpop.xlane.xlu2 %767 }
 0x4bf   : > { %1564 = vrcp.f32 %v768_v33  ;;  %v780_v37 = vand.u32 2147483648, %v768_v33  ;;  %v778_v39 = vand.u32 2147483647, %v768_v33  ;;  %vm774_vm11 = vweird.f32 %v768_v33 }
 0x4c1   : > { %v781_v41 = vor.u32 1.1754944e-38, %v780_v37  ;;  %vm779_vm13 = vcmp.eq.f32.partialorder %v778_v39, 8.507059e+37 }
 0x4c5   : > { %v1565_v34 = vpop.eup %1564 }
 0x4c6   : > { %v770_v35 = vmul.f32 %v1565_v34, %v768_v33  ;;  %vm775_vm10 = vweird.f32 %v1565_v34 }
 0x4c7   : > { %vm776_vm12 = vmor %vm774_vm11, %vm775_vm10 }
 0x4c8   : > { %v771_v36 = vsub.f32 1.0, %v770_v35 }
 0x4ca   : > { %v772_v38 = vmul.f32 %v1565_v34, %v771_v36 }
 0x4cc   : > { %v773_v40 = vadd.f32 %v1565_v34, %v772_v38 }
 0x4ce   : > { %v777_v42 = vsel %vm776_vm12, %v1565_v34, %v773_v40  ;;  %v1499_v40 = vld [vmem:[%s2122_s6 + $0x18] sm:$0xff] }
 0x4cf   : > { %v782_v43 = vsel %vm779_vm13, %v781_v41, %v777_v42 }
 0x4d0   : > { %v783_v45 = vmul.f32 %v1563_v27, %v782_v43 }
 0x4d2   : > { %1457 = vmatmul.msk.f32.vlgmr.msra.gmra.mxu0 %vm584_vm5, %v783_v45 }
 0x4d3   : > { %1023 = vmatpush.msra.mxu0 %v1479_v62 }
 0x4da   : > { %1470 = vmatmul.msk.f32.vlgmr.msrb.gmra.mxu0 %vm471_vm0, %v1835_v44 }
 0x54f   : > { %v804_v52 = vpop.f32.mrf.mxu0 }
 0x550   : > { %1459 = vmatmul.msk.f32.vlgmr.msrb.gmra.mxu1 %vm584_vm5, %v804_v52 }
 0x551   : > { %1046 = vmatpush.msrb.mxu1 %v1484_v51 }
 0x553   : > { %1047 = vmatpush.msrb.mxu1 %v1483_v53 }
 0x555   : > { %1048 = vmatpush.msrb.mxu1 %v1482_v54 }
 0x557   : > { %v902_v57 = vpop.f32.mrf.mxu0  ;;  %1049 = vmatpush.msrb.mxu1 %v1481_v55 }
 0x558   : > { %1475 = vmatmul.msk.f32.vlgmr.msra.gmra.mxu1 %vm471_vm0, %v1835_v44  ;;  %1476 = vmatpush.xpose.msk.msra.mxu2 %vm584_vm5, %v902_v57  ;;  %v1549_v57 = vld [vmem:[%s2123_s7] ss:$0 sm:$0xff] }
 0x55b   : > { %1477 = vmatmul.msk.f32.vlgmr.msra.gmra.mxu2 %vm584_vm5, %v877_v59 }
 0x55c   : > { %1071 = vmatpush.msrb.mxu2 %v1489_v56 }
 0x55e   : > { %1072 = vmatpush.msrb.mxu2 %v1488_v58 }
 0x560   : > { %1073 = vmatpush.msrb.mxu2 %v1487_v60  ;;  %1485 = vmatmul.msk.f32.vlgmr.msrb.gmra.mxu1 %vm471_vm0, %v1835_v44 }
 0x562   : > { %1074 = vmatpush.msrb.mxu2 %v1486_v61 }
 0x563   : > { %1490 = vmatmul.msk.f32.vlgmr.msrb.gmra.mxu2 %vm471_vm0, %v1835_v44 }
 0x564   : > { %1197 = vmatpush.msra.mxu2 %v1499_v40  ;;  %v1317_v40 = vld [vmem:[%s2128_s12 + $0x28] sm:$0xff] }
 0x5cd   : > { %v829_v1 = vpop.f32.mrf.mxu1 }
 0x5ce   : > { %v853_v2 = vadd.f32 %v852_v63, %v829_v1 }
 0x5d5   : > { %v927_v3 = vpop.f32.mrf.mxu1 }
 0x5d6   : > { %998 = vmatpush.msra.mxu3 %v927_v3  ;;  %v1241_v3 = vld [vmem:[%s2126_s10 + $0x18] sm:$0xff] }
 0x5d8   : > { %1096 = vmatpush.msrb.mxu3 %v1494_v13 }
 0x5da   : > { %1097 = vmatpush.msrb.mxu3 %v1493_v14 }
 0x5dc   : > { %1098 = vmatpush.msrb.mxu3 %v1492_v15 }
 0x5dd   : > { %v1051_v30 = vpop.f32.mrf.mxu1 }
 0x5de   : > { %v953_v4 = vpop.f32.mrf.mxu2  ;;  %1099 = vmatpush.msrb.mxu3 %v1491_v16  ;;  %v1550_v16 = vld [vmem:[%s2124_s8] ss:$0 sm:$0xff] }
 0x5df   : > { %v956_v5 = vsel %vm584_vm5, %v953_v4, -inf }
 0x5e0   : > { %957 = vmax.xlane.f32.xlu0 %v956_v5  ;;  %v1238_v5 = vld [vmem:[%s2126_s10] sm:$0xff] }
 0x5e6   : > { %v1076_v6 = vpop.f32.mrf.mxu2 }
 0x5e7   : > { %1496 = vmatpush.xpose.msk.msrb.mxu0 %vm584_vm5, %v1076_v6 }
 0x653   : > { %v958_v7 = vpop.xlane.xlu0 %957 }
 0x654   : > { %v959_v9 = vsub.f32 %v953_v4, %v958_v7  ;;  %v1239_v4 = vld [vmem:[%s2126_s10 + $0x8] sm:$0xff] }
 0x656   : > { %v960_v10 = vmul.f32 1.442695, %v959_v9 }
 0x658   : > { %1566 = vpow2.f32 %v960_v10 }
 0x65e   : > { %v1567_v11 = vpop.eup %1566 }
 0x65f   : > { %v962_v12 = vsel %vm584_vm5, %v1567_v11, 0.0 }
 0x660   : > { %963 = vadd.xlane.f32.xlu1 %v962_v12 }
 0x6d3   : > { %v964_v17 = vpop.xlane.xlu1 %963 }
 0x6d4   : > { %1568 = vrcp.f32 %v964_v17  ;;  %v976_v21 = vand.u32 2147483648, %v964_v17  ;;  %v974_v23 = vand.u32 2147483647, %v964_v17  ;;  %vm970_vm15 = vweird.f32 %v964_v17 }
 0x6d6   : > { %v977_v25 = vor.u32 1.1754944e-38, %v976_v21  ;;  %vm975_vm2 = vcmp.eq.f32.partialorder %v974_v23, 8.507059e+37  ;;  %v1327_v21 = vld [vmem:[%s2128_s12 + $0x78] sm:$0xff]  ;;  %v1325_v23 = vld [vmem:[%s2128_s12 + $0x68] sm:$0xff] }
 0x6da   : > { %v1569_v18 = vpop.eup %1568 }
 0x6db   : > { %v966_v19 = vmul.f32 %v1569_v18, %v964_v17  ;;  %vm971_vm14 = vweird.f32 %v1569_v18 }
 0x6dc   : > { %vm972_vm1 = vmor %vm970_vm15, %vm971_vm14 }
 0x6dd   : > { %v967_v20 = vsub.f32 1.0, %v966_v19 }
 0x6df   : > { %v968_v22 = vmul.f32 %v1569_v18, %v967_v20 }
 0x6e1   : > { %v969_v24 = vadd.f32 %v1569_v18, %v968_v22  ;;  %v1326_v22 = vld [vmem:[%s2128_s12 + $0x70] sm:$0xff] }
 0x6e3   : > { %v973_v26 = vsel %vm972_vm1, %v1569_v18, %v969_v24  ;;  %v1552_v24 = vld [vmem:[%s2127_s11] ss:$0 sm:$0xff] }
 0x6e4   : > { %v978_v27 = vsel %vm975_vm2, %v977_v25, %v973_v26  ;;  %v1324_v25 = vld [vmem:[%s2128_s12 + $0x60] sm:$0xff]  ;;  %v1323_v26 = vld [vmem:[%s2128_s12 + $0x58] sm:$0xff] }
 0x6e5   : > { %v979_v28 = vmul.f32 %v1567_v11, %v978_v27 }
 0x6e7   : > { %1478 = vmatmul.msk.f32.vlgmr.msra.gmra.mxu3 %vm584_vm5, %v979_v28 }
 0x6e8   : > { %1260 = vmatpush.msra.mxu3 %v1241_v3 }
 0x6ef   : > { %1495 = vmatmul.msk.f32.vlgmr.msrb.gmra.mxu3 %vm471_vm0, %v1835_v44 }
 0x76a   : > { %v1000_v29 = vpop.f32.mrf.mxu3 }
 0x76b   : > { %1480 = vmatmul.msk.f32.vlgmr.msra.gmra.mxu0 %vm584_vm5, %v1000_v29  ;;  %v1322_v29 = vld [vmem:[%s2128_s12 + $0x50] sm:$0xff] }
 0x76c   : > { %1331 = vmatpush.msra.mxu0 %v1327_v21 }
 0x76e   : > { %1332 = vmatpush.msra.mxu0 %v1326_v22 }
 0x770   : > { %1333 = vmatpush.msra.mxu0 %v1325_v23 }
 0x772   : > { %v1101_v31 = vpop.f32.mrf.mxu3  ;;  %1334 = vmatpush.msra.mxu0 %v1324_v25 }
 0x773   : > { %1497 = vmatmul.msk.f32.vlgmr.msrb.gmra.mxu0 %vm584_vm5, %v1051_v30  ;;  %1172 = vmatpush.msra.mxu1 %v1101_v31  ;;  %v1321_v31 = vld [vmem:[%s2128_s12 + $0x48] sm:$0xff] }
 0x774   : > { %1335 = vmatpush.msra.mxu0 %v1323_v26 }
 0x776   : > { %1336 = vmatpush.msra.mxu0 %v1322_v29 }
 0x778   : > { %1337 = vmatpush.msra.mxu0 %v1321_v31 }
 0x7e8   : > { %v1025_v32 = vpop.f32.mrf.mxu0 }
 0x7e9   : > { %v1028_v33 = vadd.f32 %v1025_v32, %v853_v2 }
 0x7f0   : > { %v1127_v34 = vpop.f32.mrf.mxu0 }
 0x7f1   : > { %v1130_v35 = vsel %vm584_vm5, %v1127_v34, -inf }
 0x7f2   : > { %1131 = vmax.xlane.f32.xlu2 %v1130_v35  ;;  %v1319_v35 = vld [vmem:[%s2128_s12 + $0x38] sm:$0xff] }
 0x865   : > { %v1132_v36 = vpop.xlane.xlu2 %1131 }
 0x866   : > { %v1133_v37 = vsub.f32 %v1127_v34, %v1132_v36 }
 0x868   : > { %v1134_v38 = vmul.f32 1.442695, %v1133_v37 }
 0x86a   : > { %1570 = vpow2.f32 %v1134_v38  ;;  %v1318_v38 = vld [vmem:[%s2128_s12 + $0x30] sm:$0xff] }
 0x870   : > { %v1571_v39 = vpop.eup %1570 }
 0x871   : > { %v1136_v44 = vsel %vm584_vm5, %v1571_v39, 0.0 }
 0x872   : > { %1137 = vadd.xlane.f32.xlu0 %v1136_v44 }
 0x8e5   : > { %v1138_v41 = vpop.xlane.xlu0 %1137 }
 0x8e6   : > { %1572 = vrcp.f32 %v1138_v41  ;;  %v1150_v46 = vand.u32 2147483648, %v1138_v41  ;;  %v1148_v48 = vand.u32 2147483647, %v1138_v41  ;;  %vm1144_vm4 = vweird.f32 %v1138_v41 }
 0x8e8   : > { %v1151_v50 = vor.u32 1.1754944e-38, %v1150_v46  ;;  %vm1149_vm7 = vcmp.eq.f32.partialorder %v1148_v48, 8.507059e+37  ;;  %v1315_v46 = vld [vmem:[%s2128_s12 + $0x18] sm:$0xff] }
 0x8ec   : > { %v1573_v42 = vpop.eup %1572 }
 0x8ed   : > { %v1140_v43 = vmul.f32 %v1573_v42, %v1138_v41  ;;  %vm1145_vm3 = vweird.f32 %v1573_v42 }
 0x8ee   : > { %vm1146_vm6 = vmor %vm1144_vm4, %vm1145_vm3 }
 0x8ef   : > { %v1141_v45 = vsub.f32 1.0, %v1140_v43  ;;  %v1316_v43 = vld [vmem:[%s2128_s12 + $0x20] sm:$0xff] }
 0x8f1   : > { %v1142_v47 = vmul.f32 %v1573_v42, %v1141_v45 }
 0x8f3   : > { %v1143_v49 = vadd.f32 %v1573_v42, %v1142_v47 }
 0x8f5   : > { %v1147_v51 = vsel %vm1146_vm6, %v1573_v42, %v1143_v49  ;;  %v1314_v49 = vld [vmem:[%s2128_s12 + $0x10] sm:$0xff] }
 0x8f6   : > { %v1152_v52 = vsel %vm1149_vm7, %v1151_v50, %v1147_v51  ;;  %v1313_v51 = vld [vmem:[%s2128_s12 + $0x8] sm:$0xff] }
 0x8f7   : > { %v1153_v53 = vmul.f32 %v1571_v39, %v1152_v52 }
 0x8f9   : > { %1498 = vmatmul.msk.f32.vlgmr.msra.gmra.mxu1 %vm584_vm5, %v1153_v53  ;;  %v1312_v53 = vld [vmem:[%s2128_s12] sm:$0xff] }
 0x976   : > { %v1174_v54 = vpop.f32.mrf.mxu1 }
 0x977   : > { %1500 = vmatmul.msk.f32.vlgmr.msra.gmra.mxu2 %vm584_vm5, %v1174_v54 }
 0x9fa   : > { %v1199_v55 = vpop.f32.mrf.mxu2 }
 0x9fb   : > { %v1202_v56 = vadd.f32 %v1199_v55, %v1028_v33  ;;  %v1320_v33 = vld [vmem:[%s2128_s12 + $0x40] sm:$0xff] }
 0x9fc   : > { %1338 = vmatpush.msra.mxu0 %v1320_v33 }
 0x9fd   : > { %v1203_v58 = vadd.f32 %v1202_v56, %v1771_v0  ;;  %v1240_v0 = vld [vmem:[%s2126_s10 + $0x10] sm:$0xff] }
 0x9fe   : > { %1261 = vmatpush.msra.mxu3 %v1240_v0  ;;  %1339 = vmatpush.msra.mxu0 %v1319_v35 }
 0x9ff   : > { %v1997_v59 = vadd.f32 %v1549_v57, %v1203_v58 }
 0xa00   : > { %1262 = vmatpush.msra.mxu3 %v1239_v4  ;;  %1340 = vmatpush.msra.mxu0 %v1318_v38 }
 0xa01   : > { %v1208_v60 = vsel %vm471_vm0, %v1997_v59, 0.0 }
 0xa02   : > { %1209 = vadd.xlane.f32.xlu1 %v1208_v60  ;;  %1263 = vmatpush.msra.mxu3 %v1238_v5 }
 0xa03   : > { %1341 = vmatpush.msra.mxu0 %v1317_v40 }
 0xa05   : > { %1342 = vmatpush.msra.mxu0 %v1316_v43 }
 0xa07   : > { %1343 = vmatpush.msra.mxu0 %v1315_v46 }
 0xa09   : > { %1344 = vmatpush.msra.mxu0 %v1314_v49 }
 0xa0b   : > { %1345 = vmatpush.msra.mxu0 %v1313_v51 }
 0xa0d   : > { %1346 = vmatpush.msra.mxu0 %v1312_v53 }
 0xa75   : > { %v1210_v61 = vpop.xlane.xlu1 %1209 }
 0xa76   : > { %v1211_v62 = vmul.f32 %v1210_v61, %v1775_v8 }
 0xa78   : > { %v1212_v63 = vsub.f32 %v1997_v59, %v1211_v62 }
 0xa7a   : > { %v1213_v1 = vmul.f32 %v1212_v63, %v1212_v63 }
 0xa7c   : > { %v1214_v2 = vsel %vm471_vm0, %v1213_v1, 0.0 }
 0xa7d   : > { %1215 = vadd.xlane.f32.xlu2 %v1214_v2 }
 0xaf0   : > { %v1216_v6 = vpop.xlane.xlu2 %1215 }
 0xaf1   : > { %v1217_v7 = vmul.f32 %v1216_v6, %v1775_v8  ;;  %v1551_v8 = vld [vmem:[%s2125_s9] ss:$0 sm:$0xff] }
 0xaf3   : > { %v1218_v9 = vadd.f32 1e-05, %v1217_v7 }
 0xaf5   : > { %1574 = vrsqrt.f32 %v1218_v9  ;;  %vm1225_vm8 = vweird.f32 %v1218_v9 }
 0xafb   : > { %v1575_v10 = vpop.eup %1574 }
 0xafc   : > { %v1220_v11 = vmul.f32 %v1575_v10, %v1218_v9  ;;  %vm1226_vm5 = vweird.f32 %v1575_v10 }
 0xafd   : > { %vm1227_vm9 = vmor %vm1225_vm8, %vm1226_vm5 }
 0xafe   : > { %v1221_v12 = vmul.f32 %v1575_v10, %v1220_v11 }
 0xb00   : > { %v1222_v13 = vmul.f32 0.5, %v1221_v12 }
 0xb02   : > { %v1223_v14 = vsub.f32 1.5, %v1222_v13 }
 0xb04   : > { %v1224_v15 = vmul.f32 %v1575_v10, %v1223_v14 }
 0xb06   : > { %v1228_v17 = vsel %vm1227_vm9, %v1575_v10, %v1224_v15 }
 0xb07   : > { %v1229_v18 = vmul.f32 %v1228_v17, %v1212_v63  ;;  %v1553_v17 = vld [vmem:[%s2129_s13] ss:$0 sm:$0xff] }
 0xb09   : > { %v1233_v19 = vmul.f32 %v1550_v16, %v1229_v18 }
 0xb0b   : > { %v1237_v20 = vadd.f32 %v1551_v8, %v1233_v19 }
 0xb0d   : > { %1501 = vmatmul.msk.f32.vlgmr.msra.gmra.mxu3 %vm471_vm0, %v1237_v20 }
 0xb90   : > { %v1265_v27 = vpop.f32.mrf.mxu3 }
 0xb91   : > { %v2042_v28 = vadd.f32 %v1552_v24, %v1265_v27 }
 0xb93   : > { %v1269_v30 = vmul.f32 0.70710677, %v2042_v28  ;;  %v1268_v14 = vmul.f32 0.5, %v2042_v28 }
 0xb95   : > { %v1270_v32 = vmul.f32 %v1269_v30, %v1269_v30 }
 0xb97   : > { %v1271_v34 = vmin.f32 %v1270_v32, 16.0 }
 0xb99   : > { %v1272_v36 = vmul.f32 2.1237322e-06, %v1271_v34  ;;  %v1283_v37 = vmul.f32 3.8918573e-05, %v1271_v34 }
 0xb9b   : > { %v1273_v39 = vadd.f32 0.00028619796, %v1272_v36  ;;  %v1284_v44 = vadd.f32 0.001143296, %v1283_v37 }
 0xb9d   : > { %v1274_v41 = vmul.f32 %v1273_v39, %v1271_v34  ;;  %v1285_v42 = vmul.f32 %v1284_v44, %v1271_v34 }
 0xb9f   : > { %v1286_v45 = vadd.f32 0.014752088, %v1285_v42  ;;  %v1275_v47 = vadd.f32 0.0036580483, %v1274_v41 }
 0xba1   : > { %v1287_v48 = vmul.f32 %v1286_v45, %v1271_v34  ;;  %v1276_v52 = vmul.f32 %v1275_v47, %v1271_v34 }
 0xba3   : > { %v1288_v50 = vadd.f32 0.112945676, %v1287_v48  ;;  %v1277_v56 = vadd.f32 0.05243302, %v1276_v52 }
 0xba5   : > { %v1289_v54 = vmul.f32 %v1288_v50, %v1271_v34  ;;  %v1278_v60 = vmul.f32 %v1277_v56, %v1271_v34 }
 0xba7   : > { %v1290_v55 = vadd.f32 0.4994258, %v1289_v54  ;;  %v1279_v61 = vadd.f32 0.18741608, %v1278_v60 }
 0xba9   : > { %v1291_v57 = vmul.f32 %v1290_v55, %v1271_v34  ;;  %v1280_v63 = vmul.f32 %v1279_v61, %v1271_v34 }
 0xbab   : > { %v1292_v58 = vadd.f32 1.0, %v1291_v57  ;;  %v1281_v0 = vadd.f32 1.1283791, %v1280_v63 }
 0xbad   : > { %1576 = vrcp.f32 %v1292_v58  ;;  %v1304_v3 = vand.u32 2147483648, %v1292_v58  ;;  %v1302_v5 = vand.u32 2147483647, %v1292_v58  ;;  %vm1298_vm11 = vweird.f32 %v1292_v58 }
 0xbae   : > { %v1282_v9 = vmul.f32 %v1281_v0, %v1269_v30 }
 0xbaf   : > { %v1305_v7 = vor.u32 1.1754944e-38, %v1304_v3  ;;  %vm1303_vm13 = vcmp.eq.f32.partialorder %v1302_v5, 8.507059e+37 }
 0xbb3   : > { %v1577_v62 = vpop.eup %1576 }
 0xbb4   : > { %v1294_v1 = vmul.f32 %v1577_v62, %v1292_v58  ;;  %vm1299_vm10 = vweird.f32 %v1577_v62 }
 0xbb5   : > { %vm1300_vm12 = vmor %vm1298_vm11, %vm1299_vm10 }
 0xbb6   : > { %v1295_v2 = vsub.f32 1.0, %v1294_v1 }
 0xbb8   : > { %v1296_v4 = vmul.f32 %v1577_v62, %v1295_v2 }
 0xbba   : > { %v1297_v6 = vadd.f32 %v1577_v62, %v1296_v4 }
 0xbbc   : > { %v1301_v10 = vsel %vm1300_vm12, %v1577_v62, %v1297_v6 }
 0xbbd   : > { %v1306_v11 = vsel %vm1303_vm13, %v1305_v7, %v1301_v10 }
 0xbbe   : > { %v1307_v12 = vmul.f32 %v1306_v11, %v1282_v9 }
 0xbc0   : > { %v1502_v13 = vclamps-f32 %v1307_v12, 1.0 }
 0xbc2   : > { %v1310_v15 = vadd.f32 1.0, %v1502_v13 }
 0xbc4   : > { %v1311_v16 = vmul.f32 %v1310_v15, %v1268_v14 }
 0xbc6   : > { %1347 = vmatmul.f32.vlgmr.msra.gmra.mxu0 %v1311_v16 }
 0xc43   : > { %v1348_v18 = vpop.f32.mrf.mxu0 }
 0xc44   : > { %v1349_v8 = vadd.f32 %v1553_v17, %v1348_v18 }
 0xc46   : > { %v1351_v19 = vadd.f32 %v1349_v8, %v1997_v59 }
 0xc48   : > { %1352 = vst.msk [vmem:[%s458_s27] sm:$0xff] %vm471_vm0, %v1351_v19 }
 0xc49   : > { %1605 = shalt.err (!%p1602_p3)
}
 0xc4a   : > { %1507 = dma.vmem_to_hbm [thread:$0]  (%p1756_p5), %s1367_s28, 128, %s1369_s1, %s1354_s17  }
 0xc4b PF: > { %p1513_p4 = scmp.ge.s32.totalorder %s1640_s16, 2  ;;  %s1380_s0 = sand.u32 1, %s1628_s29  }
 0xc4c   : > { %s1381_s26 = scalar_lea.sflag [#allocation3], %s1380_s0 }
 0xc4d   : > { %p1510_p7 = pnand %p1513_p4, %p1760_p6 }
 0xc4f   : > { %p1511_p8 = pneg %p1510_p7 }
 0xc51   : > { %1623 = dma.done.wait (%p1511_p8), %s1381_s26, 128  }
 0xc52   : > { %1625 = vsyncadd (%p1511_p8), %s1381_s26, 4294967168  ;;  %s2142_s2 = sld [smem:[#allocation5_spill]]  ;;  %p24_p9 = scmp.ge.s32.totalorder %s1743_s19, 4  }
 0xc53   : > { %s2143_s15 = sld [smem:[#allocation6_spill]]  ;;  %s2144_s29 = smov %s1632_s30 }
 0xc54   : > { %s2146_s16 = smov %s1743_s19  ;;  %26 = sbr.rel (!%p24_p9) target bundleno = 7 (0x7), region = 123 }
 0xc58   : > { %s2145_s30 = smov %s2142_s2 }
 0xc59   :  { %1387 = vsyncpa [#allocation3], 1 }
 0xc5a   :  { %1389 = vsyncpa [#allocation3 + $0x1], 1 }

</bundles_post_ra>
